<compile_context>
chip_gen: v5e
topology: v5e:2x2
jax: 0.10.0
libtpu: 0.0.40
codegen_flags: <defaults>
</compile_context>

<pallas_src>
import jax
import jax.numpy as jnp
from jax.experimental import pallas as pl
from jax.experimental.pallas import tpu as pltpu


# ---------------------------------------------------------------------------
# Helpers
# ---------------------------------------------------------------------------
def _binarize(x):
    # BinaryNet BinarizeF convention: x >= 0 -> +1, x < 0 -> -1.
    return jnp.where(x >= 0, 1.0, -1.0).astype(jnp.float32)


def _round_up(x, m):
    return ((x + m - 1) // m) * m


def _lane_tile(lpad, target=4096):
    # Largest 128-multiple divisor of lpad that is <= target lanes: bounds the
    # per-grid-step VMEM footprint for large batches while keeping a single
    # block (no grid) for small workloads.
    m = lpad // 128
    best = 1
    for d in range(1, m + 1):
        if m % d == 0 and d * 128 <= target:
            best = d
    return best * 128


# ---------------------------------------------------------------------------
# Pallas kernels
# ---------------------------------------------------------------------------
def conv_pool_sign_kernel(p_ref, w_ref, o_ref):
    """Fused BinaryConv2d -> MaxPool2d(2) -> BinaryTanh.

    p_ref: (1, F, 4*Lb) im2col patches; lane = q*Lb + j (q = pool corner, j = position)
    w_ref: (Cout, F)    pre-binarized (+-1) weights
    o_ref: (Cout, Lb)   pooled + sign()'ed activations; Lb % 128 == 0 (lane-dense)
    """
    lb = o_ref.shape[-1]
    # One wide MXU push covering all four pool corners (amortizes fill/drain).
    y = jnp.dot(w_ref[...], p_ref[0], preferred_element_type=jnp.float32)
    m = jnp.maximum(jnp.maximum(y[:, 0 * lb:1 * lb], y[:, 1 * lb:2 * lb]),
                    jnp.maximum(y[:, 2 * lb:3 * lb], y[:, 3 * lb:4 * lb]))
    o_ref[...] = jnp.where(m >= 0, 1.0, -1.0).astype(o_ref.dtype)


def conv_pool_sign_fc_kernel(p_ref, w_ref, wfc_ref, o_ref):
    """Fused BinaryConv2d -> MaxPool2d(2) -> BinaryTanh -> BinaryLinear.

    p_ref:   (F, 4*Lpad)        patches; lane = q*Lpad + p*N + n (corner, position, image)
    w_ref:   (Cout, F)          pre-binarized conv weights
    wfc_ref: (Npos, Dout, Cout) fc weights regrouped per pooled position
    o_ref:   (Dout, N)          logits (transposed; tiny final store)
    """
    lpad = p_ref.shape[-1] // 4
    n_img = o_ref.shape[-1]
    n_pos, dout, _ = wfc_ref.shape

    y = jnp.dot(w_ref[...], p_ref[...], preferred_element_type=jnp.float32)
    m = jnp.maximum(jnp.maximum(y[:, 0 * lpad:1 * lpad], y[:, 1 * lpad:2 * lpad]),
                    jnp.maximum(y[:, 2 * lpad:3 * lpad], y[:, 3 * lpad:4 * lpad]))
    act = jnp.where(m >= 0, 1.0, -1.0).astype(jnp.bfloat16)      # (Cout, Lpad), +-1

    # FC epilogue: contract (channel, position) without leaving the kernel.
    # lanes are position-major ((ph, pw, n)), so each position's N images are a
    # contiguous static lane slice; 16 tiny accumulating dots (f32 exact for +-1).
    wq = wfc_ref[...]                                            # (Npos, Dout, Cout)
    acc = jnp.zeros((dout, n_img), jnp.float32)
    for p in range(n_pos):                                       # static, Npos = 16
        a_p = act[:, p * n_img:(p + 1) * n_img]                  # (Cout, N)
        acc = acc + jnp.dot(wq[p], a_p, preferred_element_type=jnp.float32)
    o_ref[...] = acc


# ---------------------------------------------------------------------------
# Wrapper-side glue: pool-corner-major im2col (pure XLA data movement)
# ---------------------------------------------------------------------------
def _im2col_corner_major(a, K, pool, pos_major):
    """Channel-major activation (C, N, H, W) -> (pool*pool, C*K*K, L) patches.

    axis 0: 2x2 pool-window corner q = qh*pool + qw
    axis 1: conv contraction in PyTorch weight-flatten order (c, kh, kw)
    axis 2: flat position lanes; pos_major=False -> (n, ph, pw)
                                 pos_major=True  -> (ph, pw, n)   (for the fused FC)
    """
    C, N, H, W = a.shape
    Ho, Wo = H - K + 1, W - K + 1
    Hp, Wp = Ho // pool, Wo // pool
    cols = jnp.stack(
        [jnp.stack([a[:, :, kh:kh + Ho, kw:kw + Wo] for kw in range(K)], axis=-1)
         for kh in range(K)], axis=-2)                        # (C, N, Ho, Wo, K, K)
    p = cols.reshape(C, N, Hp, pool, Wp, pool, K, K)
    if pos_major:
        p = p.transpose(3, 5, 0, 6, 7, 2, 4, 1)               # (qh,qw,C,kh,kw,Hp,Wp,N)
    else:
        p = p.transpose(3, 5, 0, 6, 7, 1, 2, 4)               # (qh,qw,C,kh,kw,N,Hp,Wp)
    return p.reshape(pool * pool, C * K * K, N * Hp * Wp), Hp, Wp


# ---------------------------------------------------------------------------
# Layer wrappers
# ---------------------------------------------------------------------------
def binary_conv_pool_sign(a_cm, w2d_bin, K=5, lane_target=4096):
    """conv+pool+sign over a channel-major input.

    a_cm: (Cin, N, H, W), w2d_bin: (Cout, Cin*K*K) pre-binarized.
    Returns (act, L, Hp, Wp): act is (Cout, Lpad) bf16 with valid lanes [:L]
    ordered (n, ph, pw) — already the channel-major layout the next layer consumes.
    """
    Cin, N, H, W = a_cm.shape
    Cout, F = w2d_bin.shape
    patches, Hp, Wp = _im2col_corner_major(a_cm, K, 2, pos_major=False)
    L = N * Hp * Wp
    Lpad = _round_up(L, 128)                                   # lane-dense stores
    patches = jnp.pad(patches, ((0, 0), (0, 0), (0, Lpad - L)))
    Lb = _lane_tile(Lpad, lane_target)
    G = Lpad // Lb
    # (4, F, Lpad) -> (G, F, 4*Lb): within each lane tile the 4 corners are contiguous.
    pt = patches.reshape(4, F, G, Lb).transpose(2, 1, 0, 3).reshape(G, F, 4 * Lb)

    kwargs = {}
    if G > 1:   # VMEM-bounded lane tiling for large batches (128-aligned blocks).
        kwargs = dict(
            grid=(G,),
            in_specs=[pl.BlockSpec((1, F, 4 * Lb), lambda g: (g, 0, 0)),
                      pl.BlockSpec((Cout, F), lambda g: (0, 0))],
            out_specs=pl.BlockSpec((Cout, Lb), lambda g: (0, g)),
            compiler_params=pltpu.CompilerParams(
                dimension_semantics=("parallel",)),
        )
    act = pl.pallas_call(
        conv_pool_sign_kernel,
        out_shape=jax.ShapeDtypeStruct((Cout, Lpad), jnp.bfloat16),
        **kwargs,
    )(pt, w2d_bin)
    return act, L, Hp, Wp


def binary_conv_pool_sign_fc(a_cm, w2d_bin, wq, K=5):
    """Fused conv+pool+sign+fc tail. Returns logits^T of shape (Dout, N)."""
    Cin, N, H, W = a_cm.shape
    Cout, F = w2d_bin.shape
    patches, Hp, Wp = _im2col_corner_major(a_cm, K, 2, pos_major=True)
    assert Hp * Wp == wq.shape[0]
    L = N * Hp * Wp
    Lpad = _round_up(L, 128)
    patches = jnp.pad(patches, ((0, 0), (0, 0), (0, Lpad - L)))
    pm = patches.transpose(1, 0, 2).reshape(F, 4 * Lpad)       # corner-major lanes
    # Single un-gridded block: patches (800, 512) bf16 easily fit VMEM.
    # TODO(synk): for very large batches, tile the lane axis here and accumulate the
    # fc logits across grid steps; unnecessary at MNIST-CNN scale.
    return pl.pallas_call(
        conv_pool_sign_fc_kernel,
        out_shape=jax.ShapeDtypeStruct((wq.shape[1], N), jnp.float32),
    )(pm, w2d_bin, wq)


# ---------------------------------------------------------------------------
# CNN forward (mirrors the PyTorch module)
# ---------------------------------------------------------------------------
@jax.jit
def cnn_forward(x, params):
    w1, w2, wfc = params
    N = x.shape[0]
    Cout1 = w1.shape[0]
    Cout2 = w2.shape[0]
    Dout, Din = wfc.shape
    n_pos = Din // Cout2                                        # 4*4 pooled positions

    # Weight binarization hoisted out of the kernels (done once per call).
    # All binarized operands are exactly +-1 -> bf16 is lossless and portable
    # across v5e/v6e/v7x MXUs (int8 / fp8 would only shave negligible bytes here).
    w1b = _binarize(w1).reshape(Cout1, -1).astype(jnp.bfloat16)            # (32, 25)
    w2b = _binarize(w2).reshape(Cout2, -1).astype(jnp.bfloat16)            # (32, 800)
    # fc weight regrouped per pooled position: wq[p, o, c] = bin(wfc)[o, c*n_pos + p]
    wq = _binarize(wfc).reshape(Dout, Cout2, n_pos).transpose(2, 0, 1)
    wq = wq.astype(jnp.bfloat16)                                           # (16, 10, 32)

    # Layer 1.  The real-valued input is carried in bf16 (documented speed choice:
    # +-1 weights are exact and the conv result is immediately sign()'ed).
    x_cm = x.astype(jnp.bfloat16).transpose(1, 0, 2, 3)        # (Cin, N, 28, 28)
    act1, L1, Hp1, Wp1 = binary_conv_pool_sign(x_cm, w1b, K=5)  # (32, Lpad1) +-1 bf16

    # Layer 2 + fc, consuming layer 1's channel-major (Cout, n, h, w) lane layout
    # directly — no transpose round trip at the layer boundary.
    a1 = act1[:, :L1].reshape(Cout1, N, Hp1, Wp1)
    logits_t = binary_conv_pool_sign_fc(a1, w2b, wq, K=5)       # (10, N) f32, exact
    return logits_t.T                                           # (N, 10)


if __name__ == "__main__":
    key = jax.random.PRNGKey(0)
    k1, k2, k3, kx = jax.random.split(key, 4)
    # Parameter shapes from the module __init__ (deterministic synthetic init).
    w1 = jax.random.normal(k1, (32, 1, 5, 5), jnp.float32) * 0.1      # BinaryConv2d(1, 32, 5)
    w2 = jax.random.normal(k2, (32, 32, 5, 5), jnp.float32) * 0.1     # BinaryConv2d(32, 32, 5)
    wfc = jax.random.normal(k3, (10, 4 * 4 * 32), jnp.float32) * 0.1  # BinaryLinear(512, 10)
    # Input implied by the fc layer (4*4*32 = 512): 28x28 single channel (MNIST-like).
    x = jax.random.normal(kx, (2, 1, 28, 28), jnp.float32)

    logits = cnn_forward(x, (w1, w2, wfc))
    jax.block_until_ready(logits)
    assert logits.shape == (2, 10)
    print("KERNEL_OK")
</pallas_src>

<mosaic_0001>
module attributes {stable_mosaic.version = 11 : i64} {
  func.func @conv_pool_sign_kernel(%arg0: memref<1x25x1536xbf16, #tpu.memory_space<vmem>>, %arg1: memref<32x25xbf16, #tpu.memory_space<vmem>>, %arg2: memref<32x384xbf16, #tpu.memory_space<vmem>>) attributes {dimension_semantics = [], scalar_prefetch = 0 : i64, scratch_operands = 0 : i64, tpu.core_type = #tpu.core_type<tc>} {
    %c0 = arith.constant 0 : index
    %c0_0 = arith.constant 0 : index
    %0 = vector.load %arg1[%c0, %c0_0] : memref<32x25xbf16, #tpu.memory_space<vmem>>, vector<32x25xbf16>
    %c0_1 = arith.constant 0 : index
    %c0_2 = arith.constant 0 : index
    %c0_3 = arith.constant 0 : index
    %1 = vector.load %arg0[%c0_1, %c0_2, %c0_3] : memref<1x25x1536xbf16, #tpu.memory_space<vmem>>, vector<1x25x1536xbf16>
    %2 = vector.shape_cast %1 : vector<1x25x1536xbf16> to vector<25x1536xbf16>
    %cst = arith.constant dense<0.000000e+00> : vector<32x1536xf32>
    %3 = tpu.matmul %0, %2, %cst {dimension_numbers = #tpu.dot_dimension_numbers<[1], [0], [0], [1], [0, 0, 1, 1], [], []>} : vector<32x25xbf16>, vector<25x1536xbf16>, vector<32x1536xf32> -> vector<32x1536xf32>
    %4 = vector.extract_strided_slice %3 {offsets = [0, 0], sizes = [32, 384], strides = [1, 1]} : vector<32x1536xf32> to vector<32x384xf32>
    %5 = vector.extract_strided_slice %3 {offsets = [0, 384], sizes = [32, 384], strides = [1, 1]} : vector<32x1536xf32> to vector<32x384xf32>
    %6 = arith.maximumf %4, %5 : vector<32x384xf32>
    %7 = vector.extract_strided_slice %3 {offsets = [0, 768], sizes = [32, 384], strides = [1, 1]} : vector<32x1536xf32> to vector<32x384xf32>
    %8 = vector.extract_strided_slice %3 {offsets = [0, 1152], sizes = [32, 384], strides = [1, 1]} : vector<32x1536xf32> to vector<32x384xf32>
    %9 = arith.maximumf %7, %8 : vector<32x384xf32>
    %10 = arith.maximumf %6, %9 : vector<32x384xf32>
    %cst_4 = arith.constant 0.000000e+00 : f32
    %11 = vector.broadcast %cst_4 : f32 to vector<32x384xf32>
    %12 = arith.cmpf oge, %10, %11 : vector<32x384xf32>
    %cst_5 = arith.constant 1.000000e+00 : f32
    %cst_6 = arith.constant -1.000000e+00 : f32
    %13 = vector.broadcast %cst_5 : f32 to vector<32x384xf32>
    %14 = vector.broadcast %cst_6 : f32 to vector<32x384xf32>
    %15 = arith.select %12, %13, %14 : vector<32x384xi1>, vector<32x384xf32>
    %16 = arith.truncf %15 : vector<32x384xf32> to vector<32x384xbf16>
    %c0_7 = arith.constant 0 : index
    %c0_8 = arith.constant 0 : index
    %17 = vector.load %arg2[%c0_7, %c0_8] : memref<32x384xbf16, #tpu.memory_space<vmem>>, vector<32x384xbf16>
    tpu.vector_store %arg2[%c0_7, %c0_8], %16 {strides = array<i32>} : memref<32x384xbf16, #tpu.memory_space<vmem>>, vector<32x384xbf16>,
    return
  }
}

module attributes {stable_mosaic.version = 11 : i64} {
  func.func @conv_pool_sign_fc_kernel(%arg0: memref<800x512xbf16, #tpu.memory_space<vmem>>, %arg1: memref<32x800xbf16, #tpu.memory_space<vmem>>, %arg2: memref<16x10x32xbf16, #tpu.memory_space<vmem>>, %arg3: memref<10x2xf32, #tpu.memory_space<vmem>>) attributes {dimension_semantics = [], scalar_prefetch = 0 : i64, scratch_operands = 0 : i64, tpu.core_type = #tpu.core_type<tc>} {
    %c0 = arith.constant 0 : index
    %c0_0 = arith.constant 0 : index
    %0 = vector.load %arg1[%c0, %c0_0] : memref<32x800xbf16, #tpu.memory_space<vmem>>, vector<32x800xbf16>
    %c0_1 = arith.constant 0 : index
    %c0_2 = arith.constant 0 : index
    %1 = vector.load %arg0[%c0_1, %c0_2] : memref<800x512xbf16, #tpu.memory_space<vmem>>, vector<800x512xbf16>
    %cst = arith.constant dense<0.000000e+00> : vector<32x512xf32>
    %2 = tpu.matmul %0, %1, %cst {dimension_numbers = #tpu.dot_dimension_numbers<[1], [0], [0], [1], [0, 0, 1, 1], [], []>} : vector<32x800xbf16>, vector<800x512xbf16>, vector<32x512xf32> -> vector<32x512xf32>
    %3 = vector.extract_strided_slice %2 {offsets = [0, 0], sizes = [32, 128], strides = [1, 1]} : vector<32x512xf32> to vector<32x128xf32>
    %4 = vector.extract_strided_slice %2 {offsets = [0, 128], sizes = [32, 128], strides = [1, 1]} : vector<32x512xf32> to vector<32x128xf32>
    %5 = arith.maximumf %3, %4 : vector<32x128xf32>
    %6 = vector.extract_strided_slice %2 {offsets = [0, 256], sizes = [32, 128], strides = [1, 1]} : vector<32x512xf32> to vector<32x128xf32>
    %7 = vector.extract_strided_slice %2 {offsets = [0, 384], sizes = [32, 128], strides = [1, 1]} : vector<32x512xf32> to vector<32x128xf32>
    %8 = arith.maximumf %6, %7 : vector<32x128xf32>
    %9 = arith.maximumf %5, %8 : vector<32x128xf32>
    %cst_3 = arith.constant 0.000000e+00 : f32
    %10 = vector.broadcast %cst_3 : f32 to vector<32x128xf32>
    %11 = arith.cmpf oge, %9, %10 : vector<32x128xf32>
    %cst_4 = arith.constant 1.000000e+00 : f32
    %cst_5 = arith.constant -1.000000e+00 : f32
    %12 = vector.broadcast %cst_4 : f32 to vector<32x128xf32>
    %13 = vector.broadcast %cst_5 : f32 to vector<32x128xf32>
    %14 = arith.select %11, %12, %13 : vector<32x128xi1>, vector<32x128xf32>
    %15 = arith.truncf %14 : vector<32x128xf32> to vector<32x128xbf16>
    %c0_6 = arith.constant 0 : index
    %c0_7 = arith.constant 0 : index
    %c0_8 = arith.constant 0 : index
    %16 = vector.load %arg2[%c0_6, %c0_7, %c0_8] : memref<16x10x32xbf16, #tpu.memory_space<vmem>>, vector<16x10x32xbf16>
    %cst_9 = arith.constant 0.000000e+00 : f32
    %17 = vector.broadcast %cst_9 : f32 to vector<10x2xf32>
    %18 = vector.extract_strided_slice %15 {offsets = [0, 0], sizes = [32, 2], strides = [1, 1]} : vector<32x128xbf16> to vector<32x2xbf16>
    %19 = vector.extract_strided_slice %16 {offsets = [0, 0, 0], sizes = [1, 10, 32], strides = [1, 1, 1]} : vector<16x10x32xbf16> to vector<1x10x32xbf16>
    %20 = vector.shape_cast %19 : vector<1x10x32xbf16> to vector<10x32xbf16>
    %cst_10 = arith.constant dense<0.000000e+00> : vector<10x2xf32>
    %21 = tpu.matmul %20, %18, %cst_10 {dimension_numbers = #tpu.dot_dimension_numbers<[1], [0], [0], [1], [0, 0, 1, 1], [], []>} : vector<10x32xbf16>, vector<32x2xbf16>, vector<10x2xf32> -> vector<10x2xf32>
    %22 = arith.addf %17, %21 : vector<10x2xf32>
    %23 = vector.extract_strided_slice %15 {offsets = [0, 2], sizes = [32, 2], strides = [1, 1]} : vector<32x128xbf16> to vector<32x2xbf16>
    %24 = vector.extract_strided_slice %16 {offsets = [1, 0, 0], sizes = [1, 10, 32], strides = [1, 1, 1]} : vector<16x10x32xbf16> to vector<1x10x32xbf16>
    %25 = vector.shape_cast %24 : vector<1x10x32xbf16> to vector<10x32xbf16>
    %cst_11 = arith.constant dense<0.000000e+00> : vector<10x2xf32>
    %26 = tpu.matmul %25, %23, %cst_11 {dimension_numbers = #tpu.dot_dimension_numbers<[1], [0], [0], [1], [0, 0, 1, 1], [], []>} : vector<10x32xbf16>, vector<32x2xbf16>, vector<10x2xf32> -> vector<10x2xf32>
    %27 = arith.addf %22, %26 : vector<10x2xf32>
    %28 = vector.extract_strided_slice %15 {offsets = [0, 4], sizes = [32, 2], strides = [1, 1]} : vector<32x128xbf16> to vector<32x2xbf16>
    %29 = vector.extract_strided_slice %16 {offsets = [2, 0, 0], sizes = [1, 10, 32], strides = [1, 1, 1]} : vector<16x10x32xbf16> to vector<1x10x32xbf16>
    %30 = vector.shape_cast %29 : vector<1x10x32xbf16> to vector<10x32xbf16>
    %cst_12 = arith.constant dense<0.000000e+00> : vector<10x2xf32>
    %31 = tpu.matmul %30, %28, %cst_12 {dimension_numbers = #tpu.dot_dimension_numbers<[1], [0], [0], [1], [0, 0, 1, 1], [], []>} : vector<10x32xbf16>, vector<32x2xbf16>, vector<10x2xf32> -> vector<10x2xf32>
    %32 = arith.addf %27, %31 : vector<10x2xf32>
    %33 = vector.extract_strided_slice %15 {offsets = [0, 6], sizes = [32, 2], strides = [1, 1]} : vector<32x128xbf16> to vector<32x2xbf16>
    %34 = vector.extract_strided_slice %16 {offsets = [3, 0, 0], sizes = [1, 10, 32], strides = [1, 1, 1]} : vector<16x10x32xbf16> to vector<1x10x32xbf16>
    %35 = vector.shape_cast %34 : vector<1x10x32xbf16> to vector<10x32xbf16>
    %cst_13 = arith.constant dense<0.000000e+00> : vector<10x2xf32>
    %36 = tpu.matmul %35, %33, %cst_13 {dimension_numbers = #tpu.dot_dimension_numbers<[1], [0], [0], [1], [0, 0, 1, 1], [], []>} : vector<10x32xbf16>, vector<32x2xbf16>, vector<10x2xf32> -> vector<10x2xf32>
    %37 = arith.addf %32, %36 : vector<10x2xf32>
    %38 = vector.extract_strided_slice %15 {offsets = [0, 8], sizes = [32, 2], strides = [1, 1]} : vector<32x128xbf16> to vector<32x2xbf16>
    %39 = vector.extract_strided_slice %16 {offsets = [4, 0, 0], sizes = [1, 10, 32], strides = [1, 1, 1]} : vector<16x10x32xbf16> to vector<1x10x32xbf16>
    %40 = vector.shape_cast %39 : vector<1x10x32xbf16> to vector<10x32xbf16>
    %cst_14 = arith.constant dense<0.000000e+00> : vector<10x2xf32>
    %41 = tpu.matmul %40, %38, %cst_14 {dimension_numbers = #tpu.dot_dimension_numbers<[1], [0], [0], [1], [0, 0, 1, 1], [], []>} : vector<10x32xbf16>, vector<32x2xbf16>, vector<10x2xf32> -> vector<10x2xf32>
    %42 = arith.addf %37, %41 : vector<10x2xf32>
    %43 = vector.extract_strided_slice %15 {offsets = [0, 10], sizes = [32, 2], strides = [1, 1]} : vector<32x128xbf16> to vector<32x2xbf16>
    %44 = vector.extract_strided_slice %16 {offsets = [5, 0, 0], sizes = [1, 10, 32], strides = [1, 1, 1]} : vector<16x10x32xbf16> to vector<1x10x32xbf16>
    %45 = vector.shape_cast %44 : vector<1x10x32xbf16> to vector<10x32xbf16>
    %cst_15 = arith.constant dense<0.000000e+00> : vector<10x2xf32>
    %46 = tpu.matmul %45, %43, %cst_15 {dimension_numbers = #tpu.dot_dimension_numbers<[1], [0], [0], [1], [0, 0, 1, 1], [], []>} : vector<10x32xbf16>, vector<32x2xbf16>, vector<10x2xf32> -> vector<10x2xf32>
    %47 = arith.addf %42, %46 : vector<10x2xf32>
    %48 = vector.extract_strided_slice %15 {offsets = [0, 12], sizes = [32, 2], strides = [1, 1]} : vector<32x128xbf16> to vector<32x2xbf16>
    %49 = vector.extract_strided_slice %16 {offsets = [6, 0, 0], sizes = [1, 10, 32], strides = [1, 1, 1]} : vector<16x10x32xbf16> to vector<1x10x32xbf16>
    %50 = vector.shape_cast %49 : vector<1x10x32xbf16> to vector<10x32xbf16>
    %cst_16 = arith.constant dense<0.000000e+00> : vector<10x2xf32>
    %51 = tpu.matmul %50, %48, %cst_16 {dimension_numbers = #tpu.dot_dimension_numbers<[1], [0], [0], [1], [0, 0, 1, 1], [], []>} : vector<10x32xbf16>, vector<32x2xbf16>, vector<10x2xf32> -> vector<10x2xf32>
    %52 = arith.addf %47, %51 : vector<10x2xf32>
    %53 = vector.extract_strided_slice %15 {offsets = [0, 14], sizes = [32, 2], strides = [1, 1]} : vector<32x128xbf16> to vector<32x2xbf16>
    %54 = vector.extract_strided_slice %16 {offsets = [7, 0, 0], sizes = [1, 10, 32], strides = [1, 1, 1]} : vector<16x10x32xbf16> to vector<1x10x32xbf16>
    %55 = vector.shape_cast %54 : vector<1x10x32xbf16> to vector<10x32xbf16>
    %cst_17 = arith.constant dense<0.000000e+00> : vector<10x2xf32>
    %56 = tpu.matmul %55, %53, %cst_17 {dimension_numbers = #tpu.dot_dimension_numbers<[1], [0], [0], [1], [0, 0, 1, 1], [], []>} : vector<10x32xbf16>, vector<32x2xbf16>, vector<10x2xf32> -> vector<10x2xf32>
    %57 = arith.addf %52, %56 : vector<10x2xf32>
    %58 = vector.extract_strided_slice %15 {offsets = [0, 16], sizes = [32, 2], strides = [1, 1]} : vector<32x128xbf16> to vector<32x2xbf16>
    %59 = vector.extract_strided_slice %16 {offsets = [8, 0, 0], sizes = [1, 10, 32], strides = [1, 1, 1]} : vector<16x10x32xbf16> to vector<1x10x32xbf16>
    %60 = vector.shape_cast %59 : vector<1x10x32xbf16> to vector<10x32xbf16>
    %cst_18 = arith.constant dense<0.000000e+00> : vector<10x2xf32>
    %61 = tpu.matmul %60, %58, %cst_18 {dimension_numbers = #tpu.dot_dimension_numbers<[1], [0], [0], [1], [0, 0, 1, 1], [], []>} : vector<10x32xbf16>, vector<32x2xbf16>, vector<10x2xf32> -> vector<10x2xf32>
    %62 = arith.addf %57, %61 : vector<10x2xf32>
    %63 = vector.extract_strided_slice %15 {offsets = [0, 18], sizes = [32, 2], strides = [1, 1]} : vector<32x128xbf16> to vector<32x2xbf16>
    %64 = vector.extract_strided_slice %16 {offsets = [9, 0, 0], sizes = [1, 10, 32], strides = [1, 1, 1]} : vector<16x10x32xbf16> to vector<1x10x32xbf16>
    %65 = vector.shape_cast %64 : vector<1x10x32xbf16> to vector<10x32xbf16>
    %cst_19 = arith.constant dense<0.000000e+00> : vector<10x2xf32>
    %66 = tpu.matmul %65, %63, %cst_19 {dimension_numbers = #tpu.dot_dimension_numbers<[1], [0], [0], [1], [0, 0, 1, 1], [], []>} : vector<10x32xbf16>, vector<32x2xbf16>, vector<10x2xf32> -> vector<10x2xf32>
    %67 = arith.addf %62, %66 : vector<10x2xf32>
    %68 = vector.extract_strided_slice %15 {offsets = [0, 20], sizes = [32, 2], strides = [1, 1]} : vector<32x128xbf16> to vector<32x2xbf16>
    %69 = vector.extract_strided_slice %16 {offsets = [10, 0, 0], sizes = [1, 10, 32], strides = [1, 1, 1]} : vector<16x10x32xbf16> to vector<1x10x32xbf16>
    %70 = vector.shape_cast %69 : vector<1x10x32xbf16> to vector<10x32xbf16>
    %cst_20 = arith.constant dense<0.000000e+00> : vector<10x2xf32>
    %71 = tpu.matmul %70, %68, %cst_20 {dimension_numbers = #tpu.dot_dimension_numbers<[1], [0], [0], [1], [0, 0, 1, 1], [], []>} : vector<10x32xbf16>, vector<32x2xbf16>, vector<10x2xf32> -> vector<10x2xf32>
    %72 = arith.addf %67, %71 : vector<10x2xf32>
    %73 = vector.extract_strided_slice %15 {offsets = [0, 22], sizes = [32, 2], strides = [1, 1]} : vector<32x128xbf16> to vector<32x2xbf16>
    %74 = vector.extract_strided_slice %16 {offsets = [11, 0, 0], sizes = [1, 10, 32], strides = [1, 1, 1]} : vector<16x10x32xbf16> to vector<1x10x32xbf16>
    %75 = vector.shape_cast %74 : vector<1x10x32xbf16> to vector<10x32xbf16>
    %cst_21 = arith.constant dense<0.000000e+00> : vector<10x2xf32>
    %76 = tpu.matmul %75, %73, %cst_21 {dimension_numbers = #tpu.dot_dimension_numbers<[1], [0], [0], [1], [0, 0, 1, 1], [], []>} : vector<10x32xbf16>, vector<32x2xbf16>, vector<10x2xf32> -> vector<10x2xf32>
    %77 = arith.addf %72, %76 : vector<10x2xf32>
    %78 = vector.extract_strided_slice %15 {offsets = [0, 24], sizes = [32, 2], strides = [1, 1]} : vector<32x128xbf16> to vector<32x2xbf16>
    %79 = vector.extract_strided_slice %16 {offsets = [12, 0, 0], sizes = [1, 10, 32], strides = [1, 1, 1]} : vector<16x10x32xbf16> to vector<1x10x32xbf16>
    %80 = vector.shape_cast %79 : vector<1x10x32xbf16> to vector<10x32xbf16>
    %cst_22 = arith.constant dense<0.000000e+00> : vector<10x2xf32>
    %81 = tpu.matmul %80, %78, %cst_22 {dimension_numbers = #tpu.dot_dimension_numbers<[1], [0], [0], [1], [0, 0, 1, 1], [], []>} : vector<10x32xbf16>, vector<32x2xbf16>, vector<10x2xf32> -> vector<10x2xf32>
    %82 = arith.addf %77, %81 : vector<10x2xf32>
    %83 = vector.extract_strided_slice %15 {offsets = [0, 26], sizes = [32, 2], strides = [1, 1]} : vector<32x128xbf16> to vector<32x2xbf16>
    %84 = vector.extract_strided_slice %16 {offsets = [13, 0, 0], sizes = [1, 10, 32], strides = [1, 1, 1]} : vector<16x10x32xbf16> to vector<1x10x32xbf16>
    %85 = vector.shape_cast %84 : vector<1x10x32xbf16> to vector<10x32xbf16>
    %cst_23 = arith.constant dense<0.000000e+00> : vector<10x2xf32>
    %86 = tpu.matmul %85, %83, %cst_23 {dimension_numbers = #tpu.dot_dimension_numbers<[1], [0], [0], [1], [0, 0, 1, 1], [], []>} : vector<10x32xbf16>, vector<32x2xbf16>, vector<10x2xf32> -> vector<10x2xf32>
    %87 = arith.addf %82, %86 : vector<10x2xf32>
    %88 = vector.extract_strided_slice %15 {offsets = [0, 28], sizes = [32, 2], strides = [1, 1]} : vector<32x128xbf16> to vector<32x2xbf16>
    %89 = vector.extract_strided_slice %16 {offsets = [14, 0, 0], sizes = [1, 10, 32], strides = [1, 1, 1]} : vector<16x10x32xbf16> to vector<1x10x32xbf16>
    %90 = vector.shape_cast %89 : vector<1x10x32xbf16> to vector<10x32xbf16>
    %cst_24 = arith.constant dense<0.000000e+00> : vector<10x2xf32>
    %91 = tpu.matmul %90, %88, %cst_24 {dimension_numbers = #tpu.dot_dimension_numbers<[1], [0], [0], [1], [0, 0, 1, 1], [], []>} : vector<10x32xbf16>, vector<32x2xbf16>, vector<10x2xf32> -> vector<10x2xf32>
    %92 = arith.addf %87, %91 : vector<10x2xf32>
    %93 = vector.extract_strided_slice %15 {offsets = [0, 30], sizes = [32, 2], strides = [1, 1]} : vector<32x128xbf16> to vector<32x2xbf16>
    %94 = vector.extract_strided_slice %16 {offsets = [15, 0, 0], sizes = [1, 10, 32], strides = [1, 1, 1]} : vector<16x10x32xbf16> to vector<1x10x32xbf16>
    %95 = vector.shape_cast %94 : vector<1x10x32xbf16> to vector<10x32xbf16>
    %cst_25 = arith.constant dense<0.000000e+00> : vector<10x2xf32>
    %96 = tpu.matmul %95, %93, %cst_25 {dimension_numbers = #tpu.dot_dimension_numbers<[1], [0], [0], [1], [0, 0, 1, 1], [], []>} : vector<10x32xbf16>, vector<32x2xbf16>, vector<10x2xf32> -> vector<10x2xf32>
    %97 = arith.addf %92, %96 : vector<10x2xf32>
    %c0_26 = arith.constant 0 : index
    %c0_27 = arith.constant 0 : index
    %98 = vector.load %arg3[%c0_26, %c0_27] : memref<10x2xf32, #tpu.memory_space<vmem>>, vector<10x2xf32>
    tpu.vector_store %arg3[%c0_26, %c0_27], %97 {strides = array<i32>} : memref<10x2xf32, #tpu.memory_space<vmem>>, vector<10x2xf32>,
    return
  }
}

</mosaic_0001>

<bundles_post_ra>
// kernel: cnn_forward.2
= control target key start
LH: loop header
LB: loop body
LE: loop exit
PB: predicated region body
PF: predicated region fallthrough
CT: control target
= control target key end

     0   :  { %vm165_vm0 = vcmask 1043456   ;;  %vm166_vm1 = vcmask 1044480   ;;  %v669_v2 = vmov 65535   ;;  %vm158_vm2 = vcmask 203776   ;;  %s975_s0 = inlined_call_operand.vmem [shape: bf16[1,25,1536], index: 0, kind: input, shape index: {}]   ;;  %s976_s1 = inlined_call_operand.vmem [shape: bf16[32,25], index: 1, kind: input, shape index: {}]   ;;  %s977_s2 = inlined_call_operand.vmem [shape: bf16[32,384], index: 2, kind: output, shape index: {}]  }
   0x1   :  { %v571_v0 = vld [vmem:[%s975_s0 + $0x60] sm:$0xf]  ;;  %v661_v1 = vld [vmem:[%s975_s0 + $0x8c] sm:$0x10]  ;;  %v167_v3 = vsel %vm165_vm0, 4294967295, %v669_v2 }
   0x2   :  { %v572_v4 = vor.u32 %v661_v1, %v571_v0  ;;  %v692_v5 = vsel %vm166_vm1, %v167_v3, 0  ;;  %v655_v6 = vld [vmem:[%s975_s0 + $0x64] sm:$0xf]  ;;  %v573_v7 = vld [vmem:[%s975_s0 + $0x90] sm:$0x10] }
   0x3   :  { %v576_v8 = vor.u32 %v655_v6, %v573_v7  ;;  %v579_v9 = vld [vmem:[%s975_s0 + $0x68] sm:$0xf]  ;;  %v662_v10 = vld [vmem:[%s975_s0 + $0x94] sm:$0x10]  ;;  %v656_v11 = vld [vmem:[%s975_s0 + $0x6c] sm:$0xf] }
   0x4   :  { %v170_v12 = vand.u32 %v572_v4, %v692_v5  ;;  %v580_v13 = vor.u32 %v662_v10, %v579_v9  ;;  %v581_v14 = vld [vmem:[%s975_s0 + $0x98] sm:$0x10]  ;;  %v523_v15 = vld [vmem:[%s975_s0] sm:$0xf]  ;;  %v649_v16 = vld [vmem:[%s975_s0 + $0x2c] sm:$0xf0] }
   0x5   :  { %v173_v17 = vand.u32 %v576_v8, %v692_v5  ;;  %v584_v18 = vor.u32 %v656_v11, %v581_v14  ;;  %v643_v19 = vld [vmem:[%s975_s0 + $0x4] sm:$0xf]  ;;  %v525_v20 = vld [vmem:[%s975_s0 + $0x30] sm:$0xf0]  ;;  %v531_v21 = vld [vmem:[%s975_s0 + $0x8] sm:$0xf]  ;;  %v524_v23 = vor.u32 %v649_v16, %v523_v15 }
   0x6   :  { %211 = vmatpush.bf16.msra.mxu0 %v170_v12  ;;  %v176_v22 = vand.u32 %v580_v13, %v692_v5  ;;  %v650_v24 = vld [vmem:[%s975_s0 + $0x34] sm:$0xf0]  ;;  %v644_v25 = vld [vmem:[%s975_s0 + $0xc] sm:$0xf]  ;;  %v533_v26 = vld [vmem:[%s975_s0 + $0x38] sm:$0xf0]  ;;  %v528_v28 = vor.u32 %v643_v19, %v525_v20 }
   0x7   :  { %230 = vmatpush.bf16.msra.mxu1 %v173_v17  ;;  %v179_v27 = vand.u32 %v584_v18, %v692_v5  ;;  %v595_v29 = vld [vmem:[%s975_s0 + $0x78] sm:$0xf]  ;;  %v664_v30 = vld [vmem:[%s975_s0 + $0xa4] sm:$0x10]  ;;  %v658_v31 = vld [vmem:[%s975_s0 + $0x7c] sm:$0xf]  ;;  %v532_v32 = vor.u32 %v650_v24, %v531_v21  ;;  %v536_v37 = vor.u32 %v644_v25, %v533_v26 }
   0x8   :  { %249 = vmatpush.bf16.msra.mxu2 %v176_v22  ;;  %v596_v33 = vor.u32 %v664_v30, %v595_v29  ;;  %v597_v34 = vld [vmem:[%s975_s0 + $0xa8] sm:$0x10]  ;;  %v587_v35 = vld [vmem:[%s975_s0 + $0x70] sm:$0xf]  ;;  %v663_v36 = vld [vmem:[%s975_s0 + $0x9c] sm:$0x10] }
   0x9   :  { %268 = vmatpush.bf16.msra.mxu3 %v179_v27  ;;  %v761_v38 = vld [vmem:[%s976_s1] sm:$0xff]  ;;  %v600_v39 = vor.u32 %v658_v31, %v597_v34  ;;  %v588_v40 = vor.u32 %v663_v36, %v587_v35  ;;  %v657_v41 = vld [vmem:[%s975_s0 + $0x74] sm:$0xf]  ;;  %v547_v46 = vld [vmem:[%s975_s0 + $0x18] sm:$0xf] }
   0xa   :  { %v589_v42 = vld [vmem:[%s975_s0 + $0xa0] sm:$0x10]  ;;  %212 = vmatpush.bf16.msra.mxu0 %v524_v23  ;;  %v188_v43 = vand.u32 %v596_v33, %v692_v5  ;;  %v652_v47 = vld [vmem:[%s975_s0 + $0x44] sm:$0xf0]  ;;  %v646_v49 = vld [vmem:[%s975_s0 + $0x1c] sm:$0xf] }
   0xb   :  { %v592_v44 = vor.u32 %v657_v41, %v589_v42  ;;  %231 = vmatpush.bf16.msra.mxu1 %v528_v28  ;;  %v191_v45 = vand.u32 %v600_v39, %v692_v5  ;;  %v182_v48 = vand.u32 %v588_v40, %v692_v5  ;;  %v549_v50 = vld [vmem:[%s975_s0 + $0x48] sm:$0xf0]  ;;  %v539_v52 = vld [vmem:[%s975_s0 + $0x10] sm:$0xf]  ;;  %v651_v53 = vld [vmem:[%s975_s0 + $0x3c] sm:$0xf0]  ;;  %v548_v54 = vor.u32 %v652_v47, %v547_v46 }
   0xc   :  { %250 = vmatpush.bf16.msra.mxu2 %v532_v32  ;;  %v645_v55 = vld [vmem:[%s975_s0 + $0x14] sm:$0xf]  ;;  %v541_v56 = vld [vmem:[%s975_s0 + $0x40] sm:$0xf0]  ;;  %v552_v57 = vor.u32 %v646_v49, %v549_v50  ;;  %v540_v58 = vor.u32 %v651_v53, %v539_v52  ;;  %v611_v59 = vld [vmem:[%s975_s0 + $0x88] sm:$0xf] }
   0xd   :  { %269 = vmatpush.bf16.msra.mxu3 %v536_v37  ;;  %617 = vmatmul.msk.bf16.vlgmr.msra.gmra.mxu0 %vm158_vm2, %v761_v38  ;;  %v185_v51 = vand.u32 %v592_v44, %v692_v5  ;;  %v666_v60 = vld [vmem:[%s975_s0 + $0xb4] sm:$0x10]  ;;  %v660_v61 = vld [vmem:[%s975_s0 + $0x8c] sm:$0xf]  ;;  %v544_v62 = vor.u32 %v645_v55, %v541_v56  ;;  %v613_v0 = vld [vmem:[%s975_s0 + $0xb8] sm:$0x10] }
   0xe   :  { %619 = vmatmul.msk.bf16.vlgmr.msra.gmra.mxu1 %vm158_vm2, %v761_v38  ;;  %287 = vmatpush.bf16.msrb.mxu0 %v182_v48  ;;  %v612_v63 = vor.u32 %v666_v60, %v611_v59  ;;  %v603_v1 = vld [vmem:[%s975_s0 + $0x80] sm:$0xf]  ;;  %v665_v2 = vld [vmem:[%s975_s0 + $0xac] sm:$0x10]  ;;  %v616_v3 = vor.u32 %v660_v61, %v613_v0  ;;  %v659_v6 = vld [vmem:[%s975_s0 + $0x84] sm:$0xf] }
   0xf   :  { %621 = vmatmul.msk.bf16.vlgmr.msra.gmra.mxu2 %vm158_vm2, %v761_v38  ;;  %306 = vmatpush.bf16.msrb.mxu1 %v185_v51  ;;  %v604_v4 = vor.u32 %v665_v2, %v603_v1  ;;  %v605_v7 = vld [vmem:[%s975_s0 + $0xb0] sm:$0x10]  ;;  %v642_v13 = vld [vmem:[%s976_s1 + $0x8] sm:$0xff]  ;;  %v565_v17 = vld [vmem:[%s975_s0 + $0x58] sm:$0xf0] }
  0x10   :  { %325 = vmatpush.bf16.msrb.mxu2 %v188_v43  ;;  %623 = vmatmul.msk.bf16.vlgmr.msra.gmra.mxu3 %vm158_vm2, %v761_v38  ;;  %v200_v8 = vand.u32 %v612_v63, %v692_v5  ;;  %v608_v9 = vor.u32 %v659_v6, %v605_v7  ;;  %v203_v10 = vand.u32 %v616_v3, %v692_v5  ;;  %v563_v14 = vld [vmem:[%s975_s0 + $0x28] sm:$0xf]  ;;  %v648_v15 = vld [vmem:[%s975_s0 + $0x2c] sm:$0xf]  ;;  %v555_v18 = vld [vmem:[%s975_s0 + $0x20] sm:$0xf] }
  0x11   :  { %344 = vmatpush.bf16.msrb.mxu3 %v191_v45  ;;  %v194_v11 = vand.u32 %v604_v4, %v692_v5  ;;  %v653_v19 = vld [vmem:[%s975_s0 + $0x4c] sm:$0xf0]  ;;  %v568_v20 = vor.u32 %v648_v15, %v565_v17  ;;  %v647_v22 = vld [vmem:[%s975_s0 + $0x24] sm:$0xf]  ;;  %v557_v23 = vld [vmem:[%s975_s0 + $0x50] sm:$0xf0] }
  0x12   :  { %288 = vmatpush.bf16.msrb.mxu0 %v540_v58  ;;  %v197_v12 = vand.u32 %v608_v9, %v692_v5  ;;  %v654_v5 = vld [vmem:[%s975_s0 + $0x54] sm:$0xf0]  ;;  %v556_v21 = vor.u32 %v653_v19, %v555_v18  ;;  %v560_v24 = vor.u32 %v647_v22, %v557_v23 }
  0x13   :  { %307 = vmatpush.bf16.msrb.mxu1 %v544_v62  ;;  %v564_v16 = vor.u32 %v654_v5, %v563_v14 }
  0x14   :  { %326 = vmatpush.bf16.msrb.mxu2 %v548_v54 }
  0x15   :  { %345 = vmatpush.bf16.msrb.mxu3 %v552_v57 }
  0x16   :  { %363 = vmatpush.bf16.msra.mxu0 %v194_v11  ;;  %v670_v11 = vmov -1.0  }
  0x17   :  { %382 = vmatpush.bf16.msra.mxu1 %v197_v12 }
  0x18   :  { %401 = vmatpush.bf16.msra.mxu2 %v200_v8 }
  0x19   :  { %420 = vmatpush.bf16.msra.mxu3 %v203_v10 }
  0x1a   :  { %364 = vmatpush.bf16.msra.mxu0 %v556_v21 }
  0x1b   :  { %383 = vmatpush.bf16.msra.mxu1 %v560_v24 }
  0x1c   :  { %402 = vmatpush.bf16.msra.mxu2 %v564_v16 }
  0x1d   :  { %618 = vmatmul.msk.bf16.gmra.mxu0 %vm158_vm2, %v642_v13  ;;  %421 = vmatpush.bf16.msra.mxu3 %v568_v20 }
  0x1e   :  { %620 = vmatmul.msk.bf16.gmra.mxu1 %vm158_vm2, %v642_v13 }
  0x1f   :  { %622 = vmatmul.msk.bf16.gmra.mxu2 %vm158_vm2, %v642_v13 }
  0x20   :  { %624 = vmatmul.msk.bf16.gmra.mxu3 %vm158_vm2, %v642_v13 }
  0x2d   :  { %625 = vmatmul.msk.bf16.vlgmr.msrb.gmra.mxu0 %vm158_vm2, %v761_v38 }
  0x2e   :  { %627 = vmatmul.msk.bf16.vlgmr.msrb.gmra.mxu1 %vm158_vm2, %v761_v38 }
  0x2f   :  { %629 = vmatmul.msk.bf16.vlgmr.msrb.gmra.mxu2 %vm158_vm2, %v761_v38 }
  0x30   :  { %631 = vmatmul.msk.bf16.vlgmr.msrb.gmra.mxu3 %vm158_vm2, %v761_v38 }
  0x3d   :  { %626 = vmatmul.msk.bf16.gmra.mxu0 %vm158_vm2, %v642_v13 }
  0x3e   :  { %628 = vmatmul.msk.bf16.gmra.mxu1 %vm158_vm2, %v642_v13 }
  0x3f   :  { %630 = vmatmul.msk.bf16.gmra.mxu2 %vm158_vm2, %v642_v13 }
  0x40   :  { %632 = vmatmul.msk.bf16.gmra.mxu3 %vm158_vm2, %v642_v13 }
  0x4d   :  { %633 = vmatmul.msk.bf16.vlgmr.msra.gmra.mxu0 %vm158_vm2, %v761_v38 }
  0x4e   :  { %635 = vmatmul.msk.bf16.vlgmr.msra.gmra.mxu1 %vm158_vm2, %v761_v38 }
  0x4f   :  { %637 = vmatmul.msk.bf16.vlgmr.msra.gmra.mxu2 %vm158_vm2, %v761_v38 }
  0x50   :  { %639 = vmatmul.msk.bf16.vlgmr.msra.gmra.mxu3 %vm158_vm2, %v761_v38 }
  0x5d   :  { %634 = vmatmul.msk.bf16.gmra.mxu0 %vm158_vm2, %v642_v13 }
  0x5e   :  { %636 = vmatmul.msk.bf16.gmra.mxu1 %vm158_vm2, %v642_v13 }
  0x5f   :  { %638 = vmatmul.msk.bf16.gmra.mxu2 %vm158_vm2, %v642_v13 }
  0x60   :  { %640 = vmatmul.msk.bf16.gmra.mxu3 %vm158_vm2, %v642_v13 }
  0x8a   :  { %v214_v25 = vpop.f32.mrf.mxu0 }
  0x8b   :  { %v233_v26 = vpop.f32.mrf.mxu1 }
  0x92   :  { %v252_v27 = vpop.f32.mrf.mxu2  ;;  %v216_v28 = vpop.f32.mrf.mxu0 }
  0x93   :  { %v271_v29 = vpop.f32.mrf.mxu3  ;;  %v888_v30 = vpop.f32.mrf.mxu1 }
  0x94   :  { %v433_v60 = vmax.f32 %v214_v25, %v271_v29 }
  0x9a   :  { %v890_v31 = vpop.f32.mrf.mxu2  ;;  %v892_v32 = vpop.f32.mrf.mxu0 }
  0x9b   :  { %v273_v33 = vpop.f32.mrf.mxu3  ;;  %v894_v34 = vpop.f32.mrf.mxu1 }
  0x9c   :  { %v436_v9 = vmax.f32 %v216_v28, %v273_v33 }
  0xa2   :  { %v896_v35 = vpop.f32.mrf.mxu2  ;;  %v898_v36 = vpop.f32.mrf.mxu0 }
  0xa3   :  { %v900_v37 = vpop.f32.mrf.mxu3  ;;  %v902_v38 = vpop.f32.mrf.mxu1 }
  0xaa   :  { %v904_v39 = vpop.f32.mrf.mxu2  ;;  %v290_v40 = vpop.f32.mrf.mxu0 }
  0xab   :  { %v906_v41 = vpop.f32.mrf.mxu3  ;;  %v309_v42 = vpop.f32.mrf.mxu1  ;;  %v434_v63 = vmax.f32 %v233_v26, %v290_v40 }
  0xac   :  { %v435_v3 = vmax.f32 %v252_v27, %v309_v42  ;;  %v439_v27 = vmax.f32 %v892_v32, %v900_v37 }
  0xb2   :  { %v328_v43 = vpop.f32.mrf.mxu2  ;;  %v292_v44 = vpop.f32.mrf.mxu0 }
  0xb3   :  { %v347_v45 = vpop.f32.mrf.mxu3  ;;  %v311_v46 = vpop.f32.mrf.mxu1  ;;  %v437_v18 = vmax.f32 %v888_v30, %v292_v44 }
  0xb4   :  { %v438_v22 = vmax.f32 %v890_v31, %v311_v46 }
  0xba   :  { %v330_v47 = vpop.f32.mrf.mxu2  ;;  %v908_v48 = vpop.f32.mrf.mxu0 }
  0xbb   :  { %v349_v49 = vpop.f32.mrf.mxu3  ;;  %v910_v50 = vpop.f32.mrf.mxu1  ;;  %v440_v44 = vmax.f32 %v894_v34, %v908_v48 }
  0xbc   :  { %v441_v46 = vmax.f32 %v896_v35, %v910_v50 }
  0xc2   :  { %v333_v51 = vpop.f32.mrf.mxu2  ;;  %v912_v52 = vpop.f32.mrf.mxu0 }
  0xc3   :  { %v914_v53 = vpop.f32.mrf.mxu3  ;;  %v916_v54 = vpop.f32.mrf.mxu1 }
  0xca   :  { %v918_v55 = vpop.f32.mrf.mxu2  ;;  %v366_v58 = vpop.f32.mrf.mxu0 }
  0xcb   :  { %v920_v56 = vpop.f32.mrf.mxu3  ;;  %v385_v57 = vpop.f32.mrf.mxu1 }
  0xcc   :  { %v445_v59 = vmax.f32 %v328_v43, %v385_v57 }
  0xce   :  { %v457_v61 = vmax.f32 %v433_v60, %v445_v59 }
  0xd0   :  { %vm469_vm3 = vcmp.ge.f32.partialorder %v457_v61, 0.0  ;;  %v443_v61 = vmax.f32 %v902_v38, %v912_v52 }
  0xd1   :  { %v481_v12 = vsel %vm469_vm3, 1.0, %v670_v11 }
  0xd2   :  { %v404_v62 = vpop.f32.mrf.mxu2  ;;  %v368_v10 = vpop.f32.mrf.mxu0 }
  0xd3   :  { %v446_v0 = vmax.f32 %v347_v45, %v404_v62  ;;  %v423_v1 = vpop.f32.mrf.mxu3  ;;  %v387_v2 = vpop.f32.mrf.mxu1  ;;  %v444_v62 = vmax.f32 %v904_v39, %v916_v54 }
  0xd4   :  { %v447_v4 = vmax.f32 %v366_v58, %v423_v1  ;;  %v448_v7 = vmax.f32 %v330_v47, %v387_v2 }
  0xd5   :  { %v458_v6 = vmax.f32 %v434_v63, %v446_v0 }
  0xd6   :  { %v459_v8 = vmax.f32 %v435_v3, %v447_v4  ;;  %v460_v15 = vmax.f32 %v436_v9, %v448_v7 }
  0xd7   :  { %vm470_vm4 = vcmp.ge.f32.partialorder %v458_v6, 0.0 }
  0xd8   :  { %v482_v13 = vsel %vm470_vm4, 1.0, %v670_v11  ;;  %vm471_vm5 = vcmp.ge.f32.partialorder %v459_v8, 0.0  ;;  %vm472_vm6 = vcmp.ge.f32.partialorder %v460_v15, 0.0 }
  0xd9   :  { %v493_v14 = vpack.c.bf16 %v482_v13, %v481_v12  ;;  %v483_v5 = vsel %vm471_vm5, 1.0, %v670_v11  ;;  %v484_v28 = vsel %vm472_vm6, 1.0, %v670_v11 }
  0xda   :  { %v494_v16 = vpack.c.bf16 %v483_v5, %v483_v5  ;;  %v406_v17 = vpop.f32.mrf.mxu2  ;;  %v371_v33 = vpop.f32.mrf.mxu0 }
  0xdb   :  { %501 = vst [vmem:[%s977_s2] sm:$0xff] %v493_v14  ;;  %v449_v19 = vmax.f32 %v349_v49, %v406_v17  ;;  %v425_v20 = vpop.f32.mrf.mxu3  ;;  %v390_v21 = vpop.f32.mrf.mxu1 }
  0xdc   :  { %502 = vst [vmem:[%s977_s2 + $0x8] sm:$0xf] %v494_v16  ;;  %v450_v23 = vmax.f32 %v368_v10, %v425_v20  ;;  %v451_v25 = vmax.f32 %v333_v51, %v390_v21  ;;  %v442_v51 = vmax.f32 %v898_v36, %v906_v41 }
  0xdd   :  { %v461_v24 = vmax.f32 %v437_v18, %v449_v19 }
  0xde   :  { %v462_v26 = vmax.f32 %v438_v22, %v450_v23  ;;  %v463_v40 = vmax.f32 %v439_v27, %v451_v25 }
  0xdf   :  { %vm473_vm7 = vcmp.ge.f32.partialorder %v461_v24, 0.0 }
  0xe0   :  { %v485_v29 = vsel %vm473_vm7, 1.0, %v670_v11  ;;  %vm474_vm8 = vcmp.ge.f32.partialorder %v462_v26, 0.0  ;;  %vm475_vm9 = vcmp.ge.f32.partialorder %v463_v40, 0.0 }
  0xe1   :  { %v495_v30 = vpack.c.bf16 %v485_v29, %v484_v28  ;;  %v486_v31 = vsel %vm474_vm8, 1.0, %v670_v11 }
  0xe2   :  { %v496_v42 = vpack.c.bf16 %v486_v31, %v486_v31  ;;  %v409_v43 = vpop.f32.mrf.mxu2  ;;  %v373_v36 = vpop.f32.mrf.mxu0 }
  0xe3   :  { %503 = vst [vmem:[%s977_s2 + $0xc] sm:$0xff] %v495_v30  ;;  %v452_v32 = vmax.f32 %v914_v53, %v409_v43  ;;  %v428_v37 = vpop.f32.mrf.mxu3  ;;  %v392_v45 = vpop.f32.mrf.mxu1  ;;  %v487_v53 = vsel %vm475_vm9, 1.0, %v670_v11 }
  0xe4   :  { %504 = vst [vmem:[%s977_s2 + $0x14] sm:$0xf] %v496_v42  ;;  %v453_v47 = vmax.f32 %v371_v33, %v428_v37  ;;  %v454_v34 = vmax.f32 %v918_v55, %v392_v45 }
  0xe5   :  { %v464_v49 = vmax.f32 %v440_v44, %v452_v32 }
  0xe6   :  { %v465_v48 = vmax.f32 %v441_v46, %v453_v47  ;;  %v466_v58 = vmax.f32 %v442_v51, %v454_v34 }
  0xe7   :  { %vm476_vm10 = vcmp.ge.f32.partialorder %v464_v49, 0.0 }
  0xe8   :  { %v488_v57 = vsel %vm476_vm10, 1.0, %v670_v11  ;;  %vm477_vm11 = vcmp.ge.f32.partialorder %v465_v48, 0.0  ;;  %vm478_vm12 = vcmp.ge.f32.partialorder %v466_v58, 0.0 }
  0xe9   :  { %v497_v35 = vpack.c.bf16 %v488_v57, %v487_v53  ;;  %v489_v50 = vsel %vm477_vm11, 1.0, %v670_v11  ;;  %v490_v38 = vsel %vm478_vm12, 1.0, %v670_v11 }
  0xea   :  { %v498_v59 = vpack.c.bf16 %v489_v50, %v489_v50  ;;  %v411_v60 = vpop.f32.mrf.mxu2 }
  0xeb   :  { %505 = vst [vmem:[%s977_s2 + $0x18] sm:$0xff] %v497_v35  ;;  %v455_v41 = vmax.f32 %v920_v56, %v411_v60  ;;  %v430_v55 = vpop.f32.mrf.mxu3 }
  0xec   :  { %506 = vst [vmem:[%s977_s2 + $0x20] sm:$0xf] %v498_v59  ;;  %v456_v63 = vmax.f32 %v373_v36, %v430_v55 }
  0xed   :  { %v467_v0 = vmax.f32 %v443_v61, %v455_v41 }
  0xee   :  { %v468_v1 = vmax.f32 %v444_v62, %v456_v63 }
  0xef   :  { %vm479_vm13 = vcmp.ge.f32.partialorder %v467_v0, 0.0 }
  0xf0   :  { %v491_v52 = vsel %vm479_vm13, 1.0, %v670_v11  ;;  %vm480_vm14 = vcmp.ge.f32.partialorder %v468_v1, 0.0 }
  0xf1   :  { %v499_v2 = vpack.c.bf16 %v491_v52, %v490_v38  ;;  %v492_v56 = vsel %vm480_vm14, 1.0, %v670_v11 }
  0xf2   :  { %v500_v3 = vpack.c.bf16 %v492_v56, %v492_v56 }
  0xf3   :  { %507 = vst [vmem:[%s977_s2 + $0x24] sm:$0xff] %v499_v2 }
  0xf4   :  { %508 = vst [vmem:[%s977_s2 + $0x2c] sm:$0xf] %v500_v3 }

// kernel: cnn_forward.3
= control target key start
LH: loop header
LB: loop body
LE: loop exit
PB: predicated region body
PF: predicated region fallthrough
CT: control target
= control target key end

     0   :  { %vm1301_vm0 = vcmask 261120   ;;  %s3578_s14 = smov 126   ;;  %s3579_s15 = smov 124   ;;  %vm2378_vm5 = vcmask 15360   ;;  %vm2380_vm6 = vcmask 9216   ;;  %s5211_s0 = inlined_call_operand.vmem [shape: bf16[800,512], index: 0, kind: input, shape index: {}]   ;;  %s5212_s1 = inlined_call_operand.vmem [shape: bf16[32,800], index: 1, kind: input, shape index: {}]   ;;  %s5213_s2 = inlined_call_operand.vmem [shape: bf16[16,10,32], index: 2, kind: input, shape index: {}]   ;;  %s5214_s3 = inlined_call_operand.vmem [shape: f32[10,2], index: 3, kind: output, shape index: {}]  }
   0x1   :  { %v2556_v0 = vld [vmem:[%s5211_s0 + $0xe0] sm:$0xf]  ;;  %v3374_v1 = vld [vmem:[%s5211_s0 + $0xec] sm:$0xf0]  ;;  %s3580_s16 = smov 122   ;;  %s3581_s17 = smov 116  }
   0x2   :  { %v2684_v2 = vld [vmem:[%s5211_s0 + $0x1e0] sm:$0xf]  ;;  %v2557_v3 = vor.u32 %v3374_v1, %v2556_v0  ;;  %v3406_v4 = vld [vmem:[%s5211_s0 + $0x1ec] sm:$0xf0]  ;;  %s3582_s18 = smov 120   ;;  %s3583_s19 = smov 118  }
   0x3   :  { %v2812_v5 = vld [vmem:[%s5211_s0 + $0x2e0] sm:$0xf]  ;;  %v3438_v6 = vld [vmem:[%s5211_s0 + $0x2ec] sm:$0xf0]  ;;  %v2685_v7 = vor.u32 %v3406_v4, %v2684_v2  ;;  %s3585_s20 = smov 108   ;;  %s3586_s21 = smov 112  }
   0x4   :  { %v2813_v8 = vor.u32 %v3438_v6, %v2812_v5  ;;  %v2940_v9 = vld [vmem:[%s5211_s0 + $0x3e0] sm:$0xf]  ;;  %v3470_v10 = vld [vmem:[%s5211_s0 + $0x3ec] sm:$0xf0]  ;;  %1308 = vmatpush.bf16.msra.mxu0 %v2557_v3  ;;  %s3587_s22 = smov 110   ;;  %s3588_s23 = smov 100  }
   0x5   :  { %v2540_v11 = vld [vmem:[%s5211_s0 + $0xc0] sm:$0xf]  ;;  %v2941_v12 = vor.u32 %v3470_v10, %v2940_v9  ;;  %v3370_v13 = vld [vmem:[%s5211_s0 + $0xcc] sm:$0xf0]  ;;  %1327 = vmatpush.bf16.msra.mxu1 %v2685_v7  ;;  %s3589_s24 = smov 104   ;;  %s3590_s25 = smov 102  }
   0x6   :  { %v2668_v14 = vld [vmem:[%s5211_s0 + $0x1c0] sm:$0xf]  ;;  %v3402_v15 = vld [vmem:[%s5211_s0 + $0x1cc] sm:$0xf0]  ;;  %1346 = vmatpush.bf16.msra.mxu2 %v2813_v8  ;;  %v2541_v16 = vor.u32 %v3370_v13, %v2540_v11  ;;  %s3591_s26 = smov 98  }
   0x7   :  { %v2669_v17 = vor.u32 %v3402_v15, %v2668_v14  ;;  %v2796_v18 = vld [vmem:[%s5211_s0 + $0x2c0] sm:$0xf]  ;;  %v3434_v19 = vld [vmem:[%s5211_s0 + $0x2cc] sm:$0xf0]  ;;  %1365 = vmatpush.bf16.msra.mxu3 %v2941_v12 }
   0x8   :  { %v2924_v20 = vld [vmem:[%s5211_s0 + $0x3c0] sm:$0xf]  ;;  %v2797_v21 = vor.u32 %v3434_v19, %v2796_v18  ;;  %v3466_v22 = vld [vmem:[%s5211_s0 + $0x3cc] sm:$0xf0]  ;;  %1309 = vmatpush.bf16.msra.mxu0 %v2541_v16 }
   0x9   :  { %v2524_v23 = vld [vmem:[%s5211_s0 + $0xa0] sm:$0xf]  ;;  %v3366_v24 = vld [vmem:[%s5211_s0 + $0xac] sm:$0xf0]  ;;  %v2925_v25 = vor.u32 %v3466_v22, %v2924_v20  ;;  %1328 = vmatpush.bf16.msra.mxu1 %v2669_v17 }
   0xa   :  { %v2652_v26 = vld [vmem:[%s5211_s0 + $0x1a0] sm:$0xf]  ;;  %v3398_v27 = vld [vmem:[%s5211_s0 + $0x1ac] sm:$0xf0]  ;;  %v2525_v29 = vor.u32 %v3366_v24, %v2524_v23  ;;  %1347 = vmatpush.bf16.msra.mxu2 %v2797_v21 }
   0xb   :  { %v2780_v28 = vld [vmem:[%s5211_s0 + $0x2a0] sm:$0xf]  ;;  %v3430_v30 = vld [vmem:[%s5211_s0 + $0x2ac] sm:$0xf0]  ;;  %v2653_v33 = vor.u32 %v3398_v27, %v2652_v26  ;;  %1366 = vmatpush.bf16.msra.mxu3 %v2925_v25 }
   0xc   :  { %v2908_v31 = vld [vmem:[%s5211_s0 + $0x3a0] sm:$0xf]  ;;  %v3462_v32 = vld [vmem:[%s5211_s0 + $0x3ac] sm:$0xf0]  ;;  %v2781_v34 = vor.u32 %v3430_v30, %v2780_v28  ;;  %1310 = vmatpush.bf16.msra.mxu0 %v2525_v29  ;;  %v3333_v29 = vld [vmem:[%s5212_s1 + $0x18] sm:$0xf0] }
   0xd   :  { %v2508_v35 = vld [vmem:[%s5211_s0 + $0x80] sm:$0xf]  ;;  %v3362_v36 = vld [vmem:[%s5211_s0 + $0x8c] sm:$0xf0]  ;;  %v2909_v38 = vor.u32 %v3462_v32, %v2908_v31  ;;  %1329 = vmatpush.bf16.msra.mxu1 %v2653_v33  ;;  %v3330_v33 = vld [vmem:[%s5212_s1 + $0x4] sm:$0xf] }
   0xe   :  { %v2636_v37 = vld [vmem:[%s5211_s0 + $0x180] sm:$0xf]  ;;  %v3394_v39 = vld [vmem:[%s5211_s0 + $0x18c] sm:$0xf0]  ;;  %v2509_v44 = vor.u32 %v3362_v36, %v2508_v35  ;;  %1348 = vmatpush.bf16.msra.mxu2 %v2781_v34 }
   0xf   :  { %v2764_v40 = vld [vmem:[%s5211_s0 + $0x280] sm:$0xf]  ;;  %v3426_v41 = vld [vmem:[%s5211_s0 + $0x28c] sm:$0xf0]  ;;  %v2637_v45 = vor.u32 %v3394_v39, %v2636_v37  ;;  %1367 = vmatpush.bf16.msra.mxu3 %v2909_v38  ;;  %v2396_v39 = vld [vmem:[%s5212_s1 + $0x8] sm:$0xf] }
  0x10   :  { %v2892_v42 = vld [vmem:[%s5211_s0 + $0x380] sm:$0xf]  ;;  %v3458_v43 = vld [vmem:[%s5211_s0 + $0x38c] sm:$0xf0]  ;;  %v2765_v46 = vor.u32 %v3426_v41, %v2764_v40  ;;  %1311 = vmatpush.bf16.msra.mxu0 %v2509_v44  ;;  %v3334_v40 = vld [vmem:[%s5212_s1 + $0x20] sm:$0xf0] }
  0x11   :  { %v2492_v47 = vld [vmem:[%s5211_s0 + $0x60] sm:$0xf]  ;;  %v3358_v48 = vld [vmem:[%s5211_s0 + $0x6c] sm:$0xf0]  ;;  %v2893_v50 = vor.u32 %v3458_v43, %v2892_v42  ;;  %1330 = vmatpush.bf16.msra.mxu1 %v2637_v45  ;;  %v3331_v42 = vld [vmem:[%s5212_s1 + $0xc] sm:$0xf] }
  0x12   :  { %v2620_v49 = vld [vmem:[%s5211_s0 + $0x160] sm:$0xf]  ;;  %v3390_v51 = vld [vmem:[%s5211_s0 + $0x16c] sm:$0xf0]  ;;  %v2493_v56 = vor.u32 %v3358_v48, %v2492_v47  ;;  %1349 = vmatpush.bf16.msra.mxu2 %v2765_v46  ;;  %v2398_v43 = vld [vmem:[%s5212_s1 + $0x24] sm:$0xf0] }
  0x13   :  { %v2748_v52 = vld [vmem:[%s5211_s0 + $0x260] sm:$0xf]  ;;  %v3422_v53 = vld [vmem:[%s5211_s0 + $0x26c] sm:$0xf0]  ;;  %v2621_v57 = vor.u32 %v3390_v51, %v2620_v49  ;;  %1368 = vmatpush.bf16.msra.mxu3 %v2893_v50  ;;  %v3372_v45 = vld [vmem:[%s5211_s0 + $0xe4] sm:$0xf] }
  0x14   :  { %v2876_v54 = vld [vmem:[%s5211_s0 + $0x360] sm:$0xf]  ;;  %v3454_v55 = vld [vmem:[%s5211_s0 + $0x36c] sm:$0xf0]  ;;  %v2749_v58 = vor.u32 %v3422_v53, %v2748_v52  ;;  %1312 = vmatpush.bf16.msra.mxu0 %v2493_v56  ;;  %v2558_v48 = vld [vmem:[%s5211_s0 + $0xf0] sm:$0xf0]  ;;  %v3856_v52 = vor.u32 %v3334_v40, %v2396_v39 }
  0x15   :  { %v2476_v59 = vld [vmem:[%s5211_s0 + $0x40] sm:$0xf]  ;;  %v3354_v60 = vld [vmem:[%s5211_s0 + $0x4c] sm:$0xf0]  ;;  %v2877_v62 = vor.u32 %v3454_v55, %v2876_v54  ;;  %1331 = vmatpush.bf16.msra.mxu1 %v2621_v57  ;;  %v3864_v55 = vor.u32 %v3331_v42, %v2398_v43  ;;  %v2561_v56 = vor.u32 %v3372_v45, %v2558_v48  ;;  %v3468_v45 = vld [vmem:[%s5211_s0 + $0x3e4] sm:$0xf] }
  0x16   :  { %v2604_v61 = vld [vmem:[%s5211_s0 + $0x140] sm:$0xf]  ;;  %v3386_v63 = vld [vmem:[%s5211_s0 + $0x14c] sm:$0xf0]  ;;  %v2477_v4 = vor.u32 %v3354_v60, %v2476_v59  ;;  %1350 = vmatpush.bf16.msra.mxu2 %v2749_v58  ;;  %v3368_v58 = vld [vmem:[%s5211_s0 + $0xc4] sm:$0xf] }
  0x17   :  { %v2732_v0 = vld [vmem:[%s5211_s0 + $0x240] sm:$0xf]  ;;  %v3418_v1 = vld [vmem:[%s5211_s0 + $0x24c] sm:$0xf0]  ;;  %v2605_v5 = vor.u32 %v3386_v63, %v2604_v61  ;;  %1369 = vmatpush.bf16.msra.mxu3 %v2877_v62  ;;  %v2542_v60 = vld [vmem:[%s5211_s0 + $0xd0] sm:$0xf0] }
  0x18   :  { %v2860_v2 = vld [vmem:[%s5211_s0 + $0x340] sm:$0xf]  ;;  %v3450_v3 = vld [vmem:[%s5211_s0 + $0x34c] sm:$0xf0]  ;;  %v2733_v6 = vor.u32 %v3418_v1, %v2732_v0  ;;  %1313 = vmatpush.bf16.msra.mxu0 %v2477_v4  ;;  %v2545_v1 = vor.u32 %v3368_v58, %v2542_v60  ;;  %v2526_v4 = vld [vmem:[%s5211_s0 + $0xb0] sm:$0xf0] }
  0x19   :  { %v2460_v7 = vld [vmem:[%s5211_s0 + $0x20] sm:$0xf]  ;;  %v3350_v8 = vld [vmem:[%s5211_s0 + $0x2c] sm:$0xf0]  ;;  %v2861_v10 = vor.u32 %v3450_v3, %v2860_v2  ;;  %1332 = vmatpush.bf16.msra.mxu1 %v2605_v5  ;;  %v3364_v3 = vld [vmem:[%s5211_s0 + $0xa4] sm:$0xf] }
  0x1a   :  { %v2588_v9 = vld [vmem:[%s5211_s0 + $0x120] sm:$0xf]  ;;  %v3382_v11 = vld [vmem:[%s5211_s0 + $0x12c] sm:$0xf0]  ;;  %v2461_v16 = vor.u32 %v3350_v8, %v2460_v7  ;;  %1351 = vmatpush.bf16.msra.mxu2 %v2733_v6  ;;  %v2942_v48 = vld [vmem:[%s5211_s0 + $0x3f0] sm:$0xf0] }
  0x1b   :  { %v2716_v12 = vld [vmem:[%s5211_s0 + $0x220] sm:$0xf]  ;;  %v3414_v13 = vld [vmem:[%s5211_s0 + $0x22c] sm:$0xf0]  ;;  %v2589_v20 = vor.u32 %v3382_v11, %v2588_v9  ;;  %1370 = vmatpush.bf16.msra.mxu3 %v2861_v10  ;;  %v3464_v60 = vld [vmem:[%s5211_s0 + $0x3c4] sm:$0xf] }
  0x1c   :  { %v2844_v14 = vld [vmem:[%s5211_s0 + $0x320] sm:$0xf]  ;;  %v3446_v15 = vld [vmem:[%s5211_s0 + $0x32c] sm:$0xf0]  ;;  %v2717_v21 = vor.u32 %v3414_v13, %v2716_v12  ;;  %1314 = vmatpush.bf16.msra.mxu0 %v2461_v16  ;;  %v3360_v13 = vld [vmem:[%s5211_s0 + $0x84] sm:$0xf] }
  0x1d   :  { %v2444_v17 = vld [vmem:[%s5211_s0] sm:$0xf]  ;;  %v3346_v18 = vld [vmem:[%s5211_s0 + $0xc] sm:$0xf0]  ;;  %v2845_v25 = vor.u32 %v3446_v15, %v2844_v14  ;;  %1333 = vmatpush.bf16.msra.mxu1 %v2589_v20  ;;  %v2529_v14 = vor.u32 %v3364_v3, %v2526_v4  ;;  %v2510_v16 = vld [vmem:[%s5211_s0 + $0x90] sm:$0xf0] }
  0x1e   :  { %v2572_v19 = vld [vmem:[%s5211_s0 + $0x100] sm:$0xf]  ;;  %v3378_v22 = vld [vmem:[%s5211_s0 + $0x10c] sm:$0xf0]  ;;  %v2445_v32 = vor.u32 %v3346_v18, %v2444_v17  ;;  %1352 = vmatpush.bf16.msra.mxu2 %v2717_v21  ;;  %v2416_v17 = vld [vmem:[%s5212_s1 + $0x38] sm:$0xf] }
  0x1f   :  { %v2700_v23 = vld [vmem:[%s5211_s0 + $0x200] sm:$0xf]  ;;  %v3410_v24 = vld [vmem:[%s5211_s0 + $0x20c] sm:$0xf0]  ;;  %v2573_v36 = vor.u32 %v3378_v22, %v2572_v19  ;;  %1371 = vmatpush.bf16.msra.mxu3 %v2845_v25  ;;  %v3340_v18 = vld [vmem:[%s5212_s1 + $0x50] sm:$0xf0] }
  0x20   :  { %v2828_v26 = vld [vmem:[%s5211_s0 + $0x300] sm:$0xf]  ;;  %v3442_v27 = vld [vmem:[%s5211_s0 + $0x30c] sm:$0xf0]  ;;  %v2701_v37 = vor.u32 %v3410_v24, %v2700_v23  ;;  %1315 = vmatpush.bf16.msra.mxu0 %v2445_v32  ;;  %v3337_v20 = vld [vmem:[%s5212_s1 + $0x3c] sm:$0xf] }
  0x21   :  { %v2388_v28 = vld [vmem:[%s5212_s1] sm:$0xf]  ;;  %v3502_v31 = vld [vmem:[%s5211_s0 + $0x4ec] sm:$0xf0]  ;;  %v2829_v41 = vor.u32 %v3442_v27, %v2828_v26  ;;  %1334 = vmatpush.bf16.msra.mxu1 %v2573_v36  ;;  %v2418_v27 = vld [vmem:[%s5212_s1 + $0x54] sm:$0xf0]  ;;  %v3963_v36 = vor.u32 %v3340_v18, %v2416_v17 }
  0x22   :  { %v3068_v30 = vld [vmem:[%s5211_s0 + $0x4e0] sm:$0xf]  ;;  %v3534_v35 = vld [vmem:[%s5211_s0 + $0x5ec] sm:$0xf0]  ;;  %v3843_v46 = vor.u32 %v3333_v29, %v2388_v28  ;;  %1353 = vmatpush.bf16.msra.mxu2 %v2701_v37  ;;  %v3341_v29 = vld [vmem:[%s5212_s1 + $0x58] sm:$0xf0] }
  0x23   :  { %v3196_v34 = vld [vmem:[%s5211_s0 + $0x5e0] sm:$0xf]  ;;  %v3069_v44 = vor.u32 %v3502_v31, %v3068_v30  ;;  %v3498_v50 = vld [vmem:[%s5211_s0 + $0x4cc] sm:$0xf0]  ;;  %1372 = vmatpush.bf16.msra.mxu3 %v2829_v41  ;;  %v2513_v31 = vor.u32 %v3360_v13, %v2510_v16  ;;  %v3338_v32 = vld [vmem:[%s5212_s1 + $0x44] sm:$0xf]  ;;  %v3974_v41 = vor.u32 %v3337_v20, %v2418_v27 }
  0x24   :  { %v2390_v38 = vld [vmem:[%s5212_s1 + $0x1c] sm:$0xf0]  ;;  %v3197_v47 = vor.u32 %v3534_v35, %v3196_v34  ;;  %v3530_v54 = vld [vmem:[%s5211_s0 + $0x5cc] sm:$0xf0]  ;;  %1316 = vmatmul.bf16.vlgmr.msra.gmra.mxu0 %v3843_v46  ;;  %v3356_v35 = vld [vmem:[%s5211_s0 + $0x64] sm:$0xf] }
  0x25   :  { %v3052_v49 = vld [vmem:[%s5211_s0 + $0x4c0] sm:$0xf]  ;;  %v3854_v51 = vor.u32 %v3330_v33, %v2390_v38  ;;  %1384 = vmatpush.bf16.msrb.mxu0 %v3069_v44  ;;  %v3494_v62 = vld [vmem:[%s5211_s0 + $0x4ac] sm:$0xf0]  ;;  %1354 = vmatmul.bf16.vlgmr.msra.gmra.mxu2 %v3856_v52  ;;  %v2494_v38 = vld [vmem:[%s5211_s0 + $0x70] sm:$0xf0] }
  0x26   :  { %v3180_v53 = vld [vmem:[%s5211_s0 + $0x5c0] sm:$0xf]  ;;  %v3053_v57 = vor.u32 %v3498_v50, %v3052_v49  ;;  %1403 = vmatpush.bf16.msrb.mxu1 %v3197_v47  ;;  %v3526_v0 = vld [vmem:[%s5211_s0 + $0x5ac] sm:$0xf0]  ;;  %1373 = vmatmul.bf16.vlgmr.msra.gmra.mxu3 %v3864_v55  ;;  %v2497_v49 = vor.u32 %v3356_v35, %v2494_v38  ;;  %v2462_v4 = vld [vmem:[%s5211_s0 + $0x30] sm:$0xf0] }
  0x27   :  { %v3181_v59 = vor.u32 %v3530_v54, %v3180_v53  ;;  %v3036_v61 = vld [vmem:[%s5211_s0 + $0x4a0] sm:$0xf]  ;;  %1335 = vmatmul.bf16.vlgmr.msra.gmra.mxu1 %v3854_v51  ;;  %1441 = vmatpush.bf16.msrb.mxu3 %v2561_v56  ;;  %v3490_v7 = vld [vmem:[%s5211_s0 + $0x48c] sm:$0xf0]  ;;  %v3352_v53 = vld [vmem:[%s5211_s0 + $0x44] sm:$0xf] }
  0x28   :  { %v3164_v63 = vld [vmem:[%s5211_s0 + $0x5a0] sm:$0xf]  ;;  %v3037_v2 = vor.u32 %v3494_v62, %v3036_v61  ;;  %v3542_v9 = vld [vmem:[%s5211_s0 + $0x62c] sm:$0xf0]  ;;  %v2478_v54 = vld [vmem:[%s5211_s0 + $0x50] sm:$0xf0] }
  0x29   :  { %1385 = vmatpush.bf16.msrb.mxu0 %v3053_v57  ;;  %v3020_v5 = vld [vmem:[%s5211_s0 + $0x480] sm:$0xf]  ;;  %v3165_v6 = vor.u32 %v3526_v0, %v3164_v63  ;;  %v3522_v11 = vld [vmem:[%s5211_s0 + $0x58c] sm:$0xf0]  ;;  %v2945_v57 = vor.u32 %v3468_v45, %v2942_v48  ;;  %v2926_v61 = vld [vmem:[%s5211_s0 + $0x3d0] sm:$0xf0] }
  0x2a   :  { %1404 = vmatpush.bf16.msrb.mxu1 %v3181_v59  ;;  %v3228_v8 = vld [vmem:[%s5211_s0 + $0x620] sm:$0xf]  ;;  %v3021_v15 = vor.u32 %v3490_v7, %v3020_v5  ;;  %v3486_v22 = vld [vmem:[%s5211_s0 + $0x46c] sm:$0xf0]  ;;  %v3348_v0 = vld [vmem:[%s5211_s0 + $0x24] sm:$0xf] }
  0x2b   :  { %v3148_v10 = vld [vmem:[%s5211_s0 + $0x580] sm:$0xf]  ;;  %v3229_v12 = vor.u32 %v3542_v9, %v3228_v8  ;;  %1442 = vmatpush.bf16.msrb.mxu3 %v2545_v1  ;;  %v3518_v25 = vld [vmem:[%s5211_s0 + $0x56c] sm:$0xf0]  ;;  %v2929_v1 = vor.u32 %v3464_v60, %v2926_v61  ;;  %v3460_v5 = vld [vmem:[%s5211_s0 + $0x3a4] sm:$0xf]  ;;  %v2465_v17 = vor.u32 %v3348_v0, %v2462_v4 }
  0x2c   :  { %v3149_v19 = vor.u32 %v3522_v11, %v3148_v10  ;;  %v3004_v21 = vld [vmem:[%s5211_s0 + $0x460] sm:$0xf]  ;;  %v3538_v26 = vld [vmem:[%s5211_s0 + $0x60c] sm:$0xf0]  ;;  %v2686_v13 = vld [vmem:[%s5211_s0 + $0x1f0] sm:$0xf0] }
  0x2d   :  { %1386 = vmatpush.bf16.msrb.mxu0 %v3037_v2  ;;  %1428 = vmatpush.bf16.msrb.mxu2 %v3229_v12  ;;  %v3212_v23 = vld [vmem:[%s5211_s0 + $0x600] sm:$0xf]  ;;  %v3005_v34 = vor.u32 %v3486_v22, %v3004_v21  ;;  %v3482_v40 = vld [vmem:[%s5211_s0 + $0x44c] sm:$0xf0]  ;;  %v2481_v2 = vor.u32 %v3352_v53, %v2478_v54  ;;  %v3404_v12 = vld [vmem:[%s5211_s0 + $0x1e4] sm:$0xf] }
  0x2e   :  { %1405 = vmatpush.bf16.msrb.mxu1 %v3165_v6  ;;  %v3132_v24 = vld [vmem:[%s5211_s0 + $0x560] sm:$0xf]  ;;  %v3213_v30 = vor.u32 %v3538_v26, %v3212_v23  ;;  %v3514_v44 = vld [vmem:[%s5211_s0 + $0x54c] sm:$0xf0]  ;;  %v2910_v6 = vld [vmem:[%s5211_s0 + $0x3b0] sm:$0xf0]  ;;  %v2689_v26 = vor.u32 %v3404_v12, %v2686_v13 }
  0x2f   :  { %v2424_v28 = vld [vmem:[%s5212_s1 + $0x40] sm:$0xf]  ;;  %1443 = vmatpush.bf16.msrb.mxu3 %v2529_v14  ;;  %v3133_v37 = vor.u32 %v3518_v25, %v3132_v24  ;;  %v3478_v59 = vld [vmem:[%s5211_s0 + $0x42c] sm:$0xf0]  ;;  %v3436_v14 = vld [vmem:[%s5211_s0 + $0x2e4] sm:$0xf]  ;;  %v2913_v16 = vor.u32 %v3460_v5, %v2910_v6 }
  0x30   :  { %v2426_v33 = vld [vmem:[%s5212_s1 + $0x5c] sm:$0xf0]  ;;  %v3976_v42 = vor.u32 %v3341_v29, %v2424_v28  ;;  %v3510_v63 = vld [vmem:[%s5211_s0 + $0x52c] sm:$0xf0]  ;;  %v3456_v20 = vld [vmem:[%s5211_s0 + $0x384] sm:$0xf] }
  0x31   :  { %1387 = vmatpush.bf16.msrb.mxu0 %v3021_v15  ;;  %v2988_v39 = vld [vmem:[%s5211_s0 + $0x440] sm:$0xf]  ;;  %1429 = vmatpush.bf16.msrb.mxu2 %v3213_v30  ;;  %v3987_v47 = vor.u32 %v3338_v32, %v2426_v33  ;;  %v3474_v9 = vld [vmem:[%s5211_s0 + $0x40c] sm:$0xf0]  ;;  %v2814_v15 = vld [vmem:[%s5211_s0 + $0x2f0] sm:$0xf0] }
  0x32   :  { %1406 = vmatpush.bf16.msrb.mxu1 %v3149_v19  ;;  %v3116_v43 = vld [vmem:[%s5211_s0 + $0x540] sm:$0xf]  ;;  %v2989_v50 = vor.u32 %v3482_v40, %v2988_v39  ;;  %v3506_v11 = vld [vmem:[%s5211_s0 + $0x50c] sm:$0xf0]  ;;  %v3344_v19 = vld [vmem:[%s5211_s0 + $0x4] sm:$0xf]  ;;  %v2817_v28 = vor.u32 %v3436_v14, %v2814_v15 }
  0x33   :  { %1444 = vmatpush.bf16.msrb.mxu3 %v2513_v31  ;;  %v2972_v56 = vld [vmem:[%s5211_s0 + $0x420] sm:$0xf]  ;;  %v3117_v58 = vor.u32 %v3514_v44, %v3116_v43  ;;  %v2894_v21 = vld [vmem:[%s5211_s0 + $0x390] sm:$0xf0]  ;;  %v2404_v24 = vld [vmem:[%s5212_s1 + $0x10] sm:$0xf] }
  0x34   :  { %1321 = vmatmul.bf16.gmra.mxu0 %v3963_v36  ;;  %v3100_v62 = vld [vmem:[%s5211_s0 + $0x520] sm:$0xf]  ;;  %v2973_v3 = vor.u32 %v3478_v59, %v2972_v56  ;;  %v2446_v23 = vld [vmem:[%s5211_s0 + $0x10] sm:$0xf0]  ;;  %v3335_v25 = vld [vmem:[%s5212_s1 + $0x28] sm:$0xf0] }
  0x35   :  { %1388 = vmatpush.bf16.msrb.mxu0 %v3005_v34  ;;  %1359 = vmatmul.bf16.gmra.mxu2 %v3976_v42  ;;  %v3101_v7 = vor.u32 %v3510_v63, %v3100_v62  ;;  %v2956_v8 = vld [vmem:[%s5211_s0 + $0x400] sm:$0xf]  ;;  %v3332_v27 = vld [vmem:[%s5212_s1 + $0x14] sm:$0xf]  ;;  %v3500_v29 = vld [vmem:[%s5211_s0 + $0x4e4] sm:$0xf]  ;;  %v2897_v34 = vor.u32 %v3456_v20, %v2894_v21  ;;  %v2449_v35 = vor.u32 %v3344_v19, %v2446_v23 }
  0x36   :  { %1407 = vmatpush.bf16.msrb.mxu1 %v3133_v37  ;;  %1378 = vmatmul.bf16.gmra.mxu3 %v3987_v47  ;;  %v3084_v10 = vld [vmem:[%s5211_s0 + $0x500] sm:$0xf]  ;;  %v2957_v18 = vor.u32 %v3474_v9, %v2956_v8  ;;  %v3070_v30 = vld [vmem:[%s5211_s0 + $0x4f0] sm:$0xf0]  ;;  %v2406_v31 = vld [vmem:[%s5212_s1 + $0x2c] sm:$0xf0]  ;;  %v4101_v40 = vor.u32 %v3335_v25, %v2404_v24 }
  0x37   :  { %1340 = vmatmul.bf16.gmra.mxu1 %v3974_v41  ;;  %1498 = vmatpush.bf16.msra.mxu2 %v2945_v57  ;;  %v3085_v22 = vor.u32 %v3506_v11, %v3084_v10  ;;  %v2412_v32 = vld [vmem:[%s5212_s1 + $0x18] sm:$0xf]  ;;  %v3336_v33 = vld [vmem:[%s5212_s1 + $0x30] sm:$0xf0]  ;;  %v3400_v37 = vld [vmem:[%s5211_s0 + $0x1c4] sm:$0xf]  ;;  %v3073_v43 = vor.u32 %v3500_v29, %v3070_v30 }
  0x38   :  { %1445 = vmatpush.bf16.msrb.mxu3 %v2497_v49  ;;  %v2670_v38 = vld [vmem:[%s5211_s0 + $0x1d0] sm:$0xf0]  ;;  %v3432_v39 = vld [vmem:[%s5211_s0 + $0x2c4] sm:$0xf]  ;;  %v4112_v49 = vor.u32 %v3332_v27, %v2406_v31  ;;  %v2434_v31 = vld [vmem:[%s5212_s1 + $0x64] sm:$0xf0] }
  0x39   :  { %1389 = vmatpush.bf16.msrb.mxu0 %v2989_v50  ;;  %v2798_v44 = vld [vmem:[%s5211_s0 + $0x2d0] sm:$0xf0]  ;;  %v3452_v45 = vld [vmem:[%s5211_s0 + $0x364] sm:$0xf]  ;;  %v4114_v50 = vor.u32 %v3336_v33, %v2412_v32  ;;  %v2673_v56 = vor.u32 %v3400_v37, %v2670_v38  ;;  %v2440_v32 = vld [vmem:[%s5212_s1 + $0x50] sm:$0xf] }
  0x3a   :  { %1408 = vmatpush.bf16.msrb.mxu1 %v3117_v58  ;;  %v2878_v48 = vld [vmem:[%s5211_s0 + $0x370] sm:$0xf0]  ;;  %v3496_v53 = vld [vmem:[%s5211_s0 + $0x4c4] sm:$0xf]  ;;  %v2801_v57 = vor.u32 %v3432_v39, %v2798_v44  ;;  %v3343_v33 = vld [vmem:[%s5212_s1 + $0x68] sm:$0xf0] }
  0x3b   :  { %1499 = vmatpush.bf16.msra.mxu2 %v2929_v1  ;;  %v3054_v54 = vld [vmem:[%s5211_s0 + $0x4d0] sm:$0xf0]  ;;  %v3396_v58 = vld [vmem:[%s5211_s0 + $0x1a4] sm:$0xf]  ;;  %v2881_v61 = vor.u32 %v3452_v45, %v2878_v48 }
  0x3c   :  { %1446 = vmatpush.bf16.msrb.mxu3 %v2481_v2  ;;  %v2654_v59 = vld [vmem:[%s5211_s0 + $0x1b0] sm:$0xf0]  ;;  %v3428_v60 = vld [vmem:[%s5211_s0 + $0x2a4] sm:$0xf]  ;;  %v3057_v62 = vor.u32 %v3496_v53, %v3054_v54  ;;  %v2564_v53 = vld [vmem:[%s5211_s0 + $0xe8] sm:$0xf] }
  0x3d   :  { %1390 = vmatpush.bf16.msrb.mxu0 %v2973_v3  ;;  %v2782_v63 = vld [vmem:[%s5211_s0 + $0x2b0] sm:$0xf0]  ;;  %v3448_v0 = vld [vmem:[%s5211_s0 + $0x344] sm:$0xf]  ;;  %v2657_v4 = vor.u32 %v3396_v58, %v2654_v59  ;;  %v3375_v54 = vld [vmem:[%s5211_s0 + $0xf4] sm:$0xf0] }
  0x3e   :  { %1409 = vmatpush.bf16.msrb.mxu1 %v3101_v7  ;;  %v2862_v1 = vld [vmem:[%s5211_s0 + $0x350] sm:$0xf0]  ;;  %v3492_v2 = vld [vmem:[%s5211_s0 + $0x4a4] sm:$0xf]  ;;  %v2785_v5 = vor.u32 %v3428_v60, %v2782_v63 }
  0x3f   :  { %1500 = vmatpush.bf16.msra.mxu2 %v2913_v16  ;;  %v3038_v3 = vld [vmem:[%s5211_s0 + $0x4b0] sm:$0xf0]  ;;  %v3392_v6 = vld [vmem:[%s5211_s0 + $0x184] sm:$0xf]  ;;  %v2865_v9 = vor.u32 %v3448_v0, %v2862_v1  ;;  %v2565_v1 = vor.u32 %v3375_v54, %v2564_v53 }
  0x40   :  { %1447 = vmatpush.bf16.msrb.mxu3 %v2465_v17  ;;  %v2638_v7 = vld [vmem:[%s5211_s0 + $0x190] sm:$0xf0]  ;;  %v3424_v8 = vld [vmem:[%s5211_s0 + $0x284] sm:$0xf]  ;;  %v3041_v10 = vor.u32 %v3492_v2, %v3038_v3 }
  0x41   :  { %1391 = vmatpush.bf16.msrb.mxu0 %v2957_v18  ;;  %v2766_v11 = vld [vmem:[%s5211_s0 + $0x290] sm:$0xf0]  ;;  %v3444_v12 = vld [vmem:[%s5211_s0 + $0x324] sm:$0xf]  ;;  %v2641_v16 = vor.u32 %v3392_v6, %v2638_v7  ;;  %v2432_v18 = vld [vmem:[%s5212_s1 + $0x48] sm:$0xf] }
  0x42   :  { %1410 = vmatpush.bf16.msrb.mxu1 %v3085_v22  ;;  %v2846_v13 = vld [vmem:[%s5211_s0 + $0x330] sm:$0xf0]  ;;  %v3488_v14 = vld [vmem:[%s5211_s0 + $0x484] sm:$0xf]  ;;  %v2769_v17 = vor.u32 %v3424_v8, %v2766_v11 }
  0x43   :  { %1501 = vmatpush.bf16.msra.mxu2 %v2897_v34  ;;  %v3022_v15 = vld [vmem:[%s5211_s0 + $0x490] sm:$0xf0]  ;;  %v3342_v19 = vld [vmem:[%s5212_s1 + $0x60] sm:$0xf0]  ;;  %v2849_v23 = vor.u32 %v3444_v12, %v2846_v13 }
  0x44   :  { %1448 = vmatpush.bf16.msrb.mxu3 %v2449_v35  ;;  %1392 = vmatmul.bf16.vlgmr.msrb.gmra.mxu0 %v4101_v40  ;;  %v3388_v20 = vld [vmem:[%s5211_s0 + $0x164] sm:$0xf]  ;;  %v2622_v21 = vld [vmem:[%s5211_s0 + $0x170] sm:$0xf0]  ;;  %v3025_v24 = vor.u32 %v3488_v14, %v3022_v15  ;;  %v4226_v44 = vor.u32 %v3342_v19, %v2432_v18 }
  0x45   :  { %1460 = vmatpush.bf16.msra.mxu0 %v2689_v26  ;;  %3242 = vmatmul.msk.bf16.vlgmr.msrb.gmra.mxu2 %vm1301_vm0, %v4114_v50  ;;  %v3420_v22 = vld [vmem:[%s5211_s0 + $0x264] sm:$0xf]  ;;  %v2750_v25 = vld [vmem:[%s5211_s0 + $0x270] sm:$0xf0]  ;;  %v2625_v34 = vor.u32 %v3388_v20, %v2622_v21  ;;  %v2692_v20 = vld [vmem:[%s5211_s0 + $0x1e8] sm:$0xf] }
  0x46   :  { %1479 = vmatpush.bf16.msra.mxu1 %v2817_v28  ;;  %v3440_v26 = vld [vmem:[%s5211_s0 + $0x304] sm:$0xf]  ;;  %v2830_v27 = vld [vmem:[%s5211_s0 + $0x310] sm:$0xf0]  ;;  %v3339_v28 = vld [vmem:[%s5212_s1 + $0x4c] sm:$0xf]  ;;  %v2753_v35 = vor.u32 %v3420_v22, %v2750_v25 }
  0x47   :  { %1411 = vmatmul.bf16.vlgmr.msrb.gmra.mxu1 %v4112_v49  ;;  %1449 = vmatmul.bf16.vlgmr.msrb.gmra.mxu3 %v3843_v46  ;;  %v3484_v29 = vld [vmem:[%s5211_s0 + $0x464] sm:$0xf]  ;;  %v3006_v30 = vld [vmem:[%s5211_s0 + $0x470] sm:$0xf0]  ;;  %v2532_v21 = vld [vmem:[%s5211_s0 + $0xa8] sm:$0xf] }
  0x48   :  { %1517 = vmatpush.bf16.msra.mxu3 %v3073_v43  ;;  %1502 = vmatpush.bf16.msra.mxu2 %v2881_v61  ;;  %v3384_v37 = vld [vmem:[%s5211_s0 + $0x144] sm:$0xf]  ;;  %v2606_v38 = vld [vmem:[%s5211_s0 + $0x150] sm:$0xf0]  ;;  %v2833_v43 = vor.u32 %v3440_v26, %v2830_v27  ;;  %v3009_v45 = vor.u32 %v3484_v29, %v3006_v30  ;;  %v3367_v22 = vld [vmem:[%s5211_s0 + $0xb4] sm:$0xf0] }
  0x49   :  { %1461 = vmatpush.bf16.msra.mxu0 %v2673_v56  ;;  %v3416_v39 = vld [vmem:[%s5211_s0 + $0x244] sm:$0xf]  ;;  %v2734_v48 = vld [vmem:[%s5211_s0 + $0x250] sm:$0xf0]  ;;  %v4237_v56 = vor.u32 %v3339_v28, %v2434_v31  ;;  %v2609_v60 = vor.u32 %v3384_v37, %v2606_v38  ;;  %s3584_s1 = smov 106  }
  0x4a   :  { %1480 = vmatpush.bf16.msra.mxu1 %v2801_v57  ;;  %v4239_v57 = vor.u32 %v3343_v33, %v2440_v32  ;;  %v3480_v58 = vld [vmem:[%s5211_s0 + $0x444] sm:$0xf]  ;;  %v2990_v59 = vld [vmem:[%s5211_s0 + $0x450] sm:$0xf0]  ;;  %v2737_v61 = vor.u32 %v3416_v39, %v2734_v48  ;;  %v2533_v32 = vor.u32 %v3367_v22, %v2532_v21  ;;  %v2676_v39 = vld [vmem:[%s5211_s0 + $0x1c8] sm:$0xf] }
  0x4b   :  { %v2590_v63 = vld [vmem:[%s5211_s0 + $0x130] sm:$0xf0]  ;;  %v3412_v0 = vld [vmem:[%s5211_s0 + $0x224] sm:$0xf]  ;;  %v2993_v2 = vor.u32 %v3480_v58, %v2990_v59  ;;  %v3403_v48 = vld [vmem:[%s5211_s0 + $0x1d4] sm:$0xf0] }
  0x4c   :  { %1518 = vmatpush.bf16.msra.mxu3 %v3057_v62  ;;  %1503 = vmatpush.bf16.msra.mxu2 %v2865_v9  ;;  %v3380_v62 = vld [vmem:[%s5211_s0 + $0x124] sm:$0xf]  ;;  %v2718_v3 = vld [vmem:[%s5211_s0 + $0x230] sm:$0xf0]  ;;  %v2500_v59 = vld [vmem:[%s5211_s0 + $0x68] sm:$0xf] }
  0x4d   :  { %1462 = vmatpush.bf16.msra.mxu0 %v2657_v4  ;;  %v2548_v4 = vld [vmem:[%s5211_s0 + $0xc8] sm:$0xf]  ;;  %v3476_v6 = vld [vmem:[%s5211_s0 + $0x424] sm:$0xf]  ;;  %v2974_v7 = vld [vmem:[%s5211_s0 + $0x430] sm:$0xf0]  ;;  %v2593_v8 = vor.u32 %v3380_v62, %v2590_v63  ;;  %v2721_v11 = vor.u32 %v3412_v0, %v2718_v3  ;;  %v2677_v62 = vor.u32 %v3403_v48, %v2676_v39 }
  0x4e   :  { %1481 = vmatpush.bf16.msra.mxu1 %v2785_v5  ;;  %v3371_v5 = vld [vmem:[%s5211_s0 + $0xd4] sm:$0xf0]  ;;  %v3376_v9 = vld [vmem:[%s5211_s0 + $0x104] sm:$0xf]  ;;  %v2702_v13 = vld [vmem:[%s5211_s0 + $0x210] sm:$0xf0] }
  0x4f   :  { %v3408_v12 = vld [vmem:[%s5211_s0 + $0x204] sm:$0xf]  ;;  %v2549_v15 = vor.u32 %v3371_v5, %v2548_v4  ;;  %v3198_v19 = vld [vmem:[%s5211_s0 + $0x5f0] sm:$0xf0]  ;;  %v2660_v0 = vld [vmem:[%s5211_s0 + $0x1a8] sm:$0xf] }
  0x50   :  { %1519 = vmatpush.bf16.msra.mxu3 %v3041_v10  ;;  %1504 = vmatpush.bf16.msra.mxu2 %v2849_v23  ;;  %v2574_v10 = vld [vmem:[%s5211_s0 + $0x110] sm:$0xf0]  ;;  %v3472_v14 = vld [vmem:[%s5211_s0 + $0x404] sm:$0xf]  ;;  %v2705_v27 = vor.u32 %v3408_v12, %v2702_v13  ;;  %v2948_v5 = vld [vmem:[%s5211_s0 + $0x3e8] sm:$0xf] }
  0x51   :  { %1463 = vmatpush.bf16.msra.mxu0 %v2641_v16  ;;  %v2977_v16 = vor.u32 %v3476_v6, %v2974_v7  ;;  %v3532_v18 = vld [vmem:[%s5211_s0 + $0x5e4] sm:$0xf]  ;;  %v2577_v23 = vor.u32 %v3376_v9, %v2574_v10  ;;  %v3230_v26 = vld [vmem:[%s5211_s0 + $0x630] sm:$0xf0]  ;;  %v2484_v6 = vld [vmem:[%s5211_s0 + $0x48] sm:$0xf] }
  0x52   :  { %1482 = vmatpush.bf16.msra.mxu1 %v2769_v17  ;;  %v2958_v17 = vld [vmem:[%s5211_s0 + $0x410] sm:$0xf0]  ;;  %v3540_v25 = vld [vmem:[%s5211_s0 + $0x624] sm:$0xf]  ;;  %v3201_v28 = vor.u32 %v3532_v18, %v3198_v19  ;;  %v3355_v7 = vld [vmem:[%s5211_s0 + $0x54] sm:$0xf0] }
  0x53   :  { %v2961_v29 = vor.u32 %v3472_v14, %v2958_v17  ;;  %v3528_v30 = vld [vmem:[%s5211_s0 + $0x5c4] sm:$0xf]  ;;  %v3182_v31 = vld [vmem:[%s5211_s0 + $0x5d0] sm:$0xf0]  ;;  %v3233_v37 = vor.u32 %v3540_v25, %v3230_v26  ;;  %v2644_v12 = vld [vmem:[%s5211_s0 + $0x188] sm:$0xf]  ;;  %v2485_v18 = vor.u32 %v3355_v7, %v2484_v6 }
  0x54   :  { %1520 = vmatpush.bf16.msra.mxu3 %v3025_v24  ;;  %1505 = vmatpush.bf16.msra.mxu2 %v2833_v43  ;;  %v3407_v24 = vld [vmem:[%s5211_s0 + $0x1f4] sm:$0xf0]  ;;  %v3185_v38 = vor.u32 %v3528_v30, %v3182_v31  ;;  %v3536_v43 = vld [vmem:[%s5211_s0 + $0x604] sm:$0xf]  ;;  %v3166_v54 = vld [vmem:[%s5211_s0 + $0x5b0] sm:$0xf0] }
  0x55   :  { %1464 = vmatpush.bf16.msra.mxu0 %v2625_v34  ;;  %3243 = vmatmul.msk.bf16.gmra.mxu2 %vm1301_vm0, %v4239_v57  ;;  %v2693_v33 = vor.u32 %v3407_v24, %v2692_v20  ;;  %v2516_v34 = vld [vmem:[%s5211_s0 + $0x88] sm:$0xf]  ;;  %v3524_v53 = vld [vmem:[%s5211_s0 + $0x5a4] sm:$0xf]  ;;  %v3150_v3 = vld [vmem:[%s5211_s0 + $0x590] sm:$0xf0] }
  0x56   :  { %1483 = vmatpush.bf16.msra.mxu1 %v2753_v35  ;;  %1397 = vmatmul.bf16.gmra.mxu0 %v4226_v44  ;;  %v3363_v35 = vld [vmem:[%s5211_s0 + $0x94] sm:$0xf0]  ;;  %v3169_v63 = vor.u32 %v3524_v53, %v3166_v54  ;;  %v2932_v13 = vld [vmem:[%s5211_s0 + $0x3c8] sm:$0xf]  ;;  %v3134_v17 = vld [vmem:[%s5211_s0 + $0x570] sm:$0xf0] }
  0x57   :  { %1416 = vmatmul.bf16.gmra.mxu1 %v4237_v56  ;;  %1454 = vmatmul.bf16.gmra.mxu3 %v3963_v36  ;;  %v2517_v58 = vor.u32 %v3363_v35, %v2516_v34  ;;  %v3467_v14 = vld [vmem:[%s5211_s0 + $0x3d4] sm:$0xf0]  ;;  %v2468_v20 = vld [vmem:[%s5211_s0 + $0x28] sm:$0xf]  ;;  %v3102_v48 = vld [vmem:[%s5211_s0 + $0x530] sm:$0xf0] }
  0x58   :  { %1521 = vmatpush.bf16.msra.mxu3 %v3009_v45  ;;  %1574 = vmatpush.bf16.msrb.mxu2 %v2565_v1  ;;  %v3214_v45 = vld [vmem:[%s5211_s0 + $0x610] sm:$0xf0]  ;;  %v3399_v1 = vld [vmem:[%s5211_s0 + $0x1b4] sm:$0xf0]  ;;  %v2933_v19 = vor.u32 %v3467_v14, %v2932_v13  ;;  %v2916_v22 = vld [vmem:[%s5211_s0 + $0x3a8] sm:$0xf] }
  0x59   :  { %1465 = vmatpush.bf16.msra.mxu0 %v2609_v60  ;;  %v3359_v60 = vld [vmem:[%s5211_s0 + $0x74] sm:$0xf0]  ;;  %v2661_v10 = vor.u32 %v3399_v1, %v2660_v0  ;;  %v2628_v26 = vld [vmem:[%s5211_s0 + $0x168] sm:$0xf] }
  0x5a   :  { %1484 = vmatpush.bf16.msra.mxu1 %v2737_v61  ;;  %v3217_v61 = vor.u32 %v3536_v43, %v3214_v45  ;;  %v2501_v4 = vor.u32 %v3359_v60, %v2500_v59  ;;  %v3351_v21 = vld [vmem:[%s5211_s0 + $0x34] sm:$0xf0]  ;;  %v3508_v45 = vld [vmem:[%s5211_s0 + $0x524] sm:$0xf]  ;;  %v2900_v54 = vld [vmem:[%s5211_s0 + $0x388] sm:$0xf] }
  0x5b   :  { %v2469_v30 = vor.u32 %v3351_v21, %v2468_v20  ;;  %v3503_v39 = vld [vmem:[%s5211_s0 + $0x4f4] sm:$0xf0]  ;;  %v2596_v59 = vld [vmem:[%s5211_s0 + $0x128] sm:$0xf] }
  0x5c   :  { %1522 = vmatpush.bf16.msra.mxu3 %v2993_v2  ;;  %1575 = vmatpush.bf16.msrb.mxu2 %v2549_v15  ;;  %v3520_v2 = vld [vmem:[%s5211_s0 + $0x584] sm:$0xf]  ;;  %v3395_v15 = vld [vmem:[%s5211_s0 + $0x194] sm:$0xf0]  ;;  %v3060_v0 = vld [vmem:[%s5211_s0 + $0x4c8] sm:$0xf] }
  0x5d   :  { %1466 = vmatpush.bf16.msra.mxu0 %v2593_v8  ;;  %v3471_v8 = vld [vmem:[%s5211_s0 + $0x3f4] sm:$0xf0]  ;;  %v2645_v24 = vor.u32 %v3395_v15, %v2644_v12  ;;  %v2884_v7 = vld [vmem:[%s5211_s0 + $0x368] sm:$0xf] }
  0x5e   :  { %1485 = vmatpush.bf16.msra.mxu1 %v2721_v11  ;;  %v2949_v9 = vor.u32 %v3471_v8, %v2948_v5  ;;  %v3153_v11 = vor.u32 %v3520_v2, %v3150_v3  ;;  %v3387_v43 = vld [vmem:[%s5211_s0 + $0x154] sm:$0xf0]  ;;  %v3504_v2 = vld [vmem:[%s5211_s0 + $0x504] sm:$0xf]  ;;  %v3086_v3 = vld [vmem:[%s5211_s0 + $0x510] sm:$0xf0] }
  0x5f   :  { %v3499_v1 = vld [vmem:[%s5211_s0 + $0x4d4] sm:$0xf0]  ;;  %v3044_v12 = vld [vmem:[%s5211_s0 + $0x4a8] sm:$0xf] }
  0x60   :  { %1523 = vmatpush.bf16.msra.mxu3 %v2977_v16  ;;  %1576 = vmatpush.bf16.msrb.mxu2 %v2533_v32  ;;  %v3516_v16 = vld [vmem:[%s5211_s0 + $0x564] sm:$0xf]  ;;  %v2452_v32 = vld [vmem:[%s5211_s0 + $0x8] sm:$0xf]  ;;  %v3439_v6 = vld [vmem:[%s5211_s0 + $0x2f4] sm:$0xf0] }
  0x61   :  { %1467 = vmatpush.bf16.msra.mxu0 %v2577_v23  ;;  %v3463_v23 = vld [vmem:[%s5211_s0 + $0x3b4] sm:$0xf0]  ;;  %v3137_v25 = vor.u32 %v3516_v16, %v3134_v17  ;;  %v2580_v14 = vld [vmem:[%s5211_s0 + $0x108] sm:$0xf] }
  0x62   :  { %1486 = vmatpush.bf16.msra.mxu1 %v2705_v27  ;;  %v3391_v27 = vld [vmem:[%s5211_s0 + $0x174] sm:$0xf0]  ;;  %v2917_v31 = vor.u32 %v3463_v23, %v2916_v22  ;;  %v3204_v17 = vld [vmem:[%s5211_s0 + $0x5e8] sm:$0xf] }
  0x63   :  { %v2629_v34 = vor.u32 %v3391_v27, %v2628_v26  ;;  %v3455_v8 = vld [vmem:[%s5211_s0 + $0x374] sm:$0xf0]  ;;  %v2804_v20 = vld [vmem:[%s5211_s0 + $0x2c8] sm:$0xf] }
  0x64   :  { %1524 = vmatpush.bf16.msra.mxu3 %v2961_v29  ;;  %1577 = vmatpush.bf16.msrb.mxu2 %v2517_v58  ;;  %v3118_v29 = vld [vmem:[%s5211_s0 + $0x550] sm:$0xf0]  ;;  %v3459_v58 = vld [vmem:[%s5211_s0 + $0x394] sm:$0xf0]  ;;  %v2868_v23 = vld [vmem:[%s5211_s0 + $0x348] sm:$0xf] }
  0x65   :  { %1536 = vmatpush.bf16.msrb.mxu0 %v3201_v28  ;;  %1506 = vmatmul.bf16.vlgmr.msra.gmra.mxu2 %v3864_v55  ;;  %v3512_v28 = vld [vmem:[%s5211_s0 + $0x544] sm:$0xf]  ;;  %v2901_v5 = vor.u32 %v3459_v58, %v2900_v54  ;;  %v3495_v13 = vld [vmem:[%s5211_s0 + $0x4b4] sm:$0xf0]  ;;  %v3028_v26 = vld [vmem:[%s5211_s0 + $0x488] sm:$0xf] }
  0x66   :  { %1561 = vmatpush.bf16.msrb.mxu1 %v3233_v37  ;;  %1468 = vmatmul.bf16.vlgmr.msra.gmra.mxu0 %v3854_v51  ;;  %v3121_v35 = vor.u32 %v3512_v28, %v3118_v29  ;;  %v2612_v37 = vld [vmem:[%s5211_s0 + $0x148] sm:$0xf]  ;;  %v3379_v15 = vld [vmem:[%s5211_s0 + $0x114] sm:$0xf0]  ;;  %v3045_v22 = vor.u32 %v3495_v13, %v3044_v12 }
  0x67   :  { %1487 = vmatmul.bf16.vlgmr.msra.gmra.mxu1 %v3856_v52  ;;  %1525 = vmatmul.bf16.vlgmr.msra.gmra.mxu3 %v4101_v40  ;;  %v3435_v21 = vld [vmem:[%s5211_s0 + $0x2d4] sm:$0xf0]  ;;  %v2772_v58 = vld [vmem:[%s5211_s0 + $0x288] sm:$0xf] }
  0x68   :  { %1593 = vmatpush.bf16.msrb.mxu3 %v2693_v33  ;;  %1578 = vmatpush.bf16.msrb.mxu2 %v2501_v4  ;;  %v3347_v33 = vld [vmem:[%s5211_s0 + $0x14] sm:$0xf0]  ;;  %v2820_v4 = vld [vmem:[%s5211_s0 + $0x2e8] sm:$0xf]  ;;  %v2805_v29 = vor.u32 %v3435_v21, %v2804_v20 }
  0x69   :  { %1537 = vmatpush.bf16.msrb.mxu0 %v3185_v38  ;;  %v3076_v38 = vld [vmem:[%s5211_s0 + $0x4e8] sm:$0xf]  ;;  %v2453_v53 = vor.u32 %v3347_v33, %v2452_v32  ;;  %v2821_v16 = vor.u32 %v3439_v6, %v2820_v4  ;;  %v3491_v27 = vld [vmem:[%s5211_s0 + $0x494] sm:$0xf0]  ;;  %v2566_v6 = vld [vmem:[%s5211_s0 + $0xf8] sm:$0xf0] }
  0x6a   :  { %1562 = vmatpush.bf16.msrb.mxu1 %v3217_v61  ;;  %v3077_v60 = vor.u32 %v3503_v39, %v3076_v38  ;;  %v2613_v61 = vor.u32 %v3387_v43, %v2612_v37  ;;  %v3029_v33 = vor.u32 %v3491_v27, %v3028_v26  ;;  %v3012_v37 = vld [vmem:[%s5211_s0 + $0x468] sm:$0xf]  ;;  %v3487_v39 = vld [vmem:[%s5211_s0 + $0x474] sm:$0xf0] }
  0x6b   :  { %v2852_v43 = vld [vmem:[%s5211_s0 + $0x328] sm:$0xf]  ;;  %v3523_v4 = vld [vmem:[%s5211_s0 + $0x594] sm:$0xf0] }
  0x6c   :  { %1594 = vmatpush.bf16.msrb.mxu3 %v2677_v62  ;;  %1579 = vmatpush.bf16.msrb.mxu2 %v2485_v18  ;;  %v3105_v62 = vor.u32 %v3508_v45, %v3102_v48  ;;  %v2885_v18 = vor.u32 %v3455_v8, %v2884_v7  ;;  %v3447_v45 = vld [vmem:[%s5211_s0 + $0x334] sm:$0xf0]  ;;  %v3172_v48 = vld [vmem:[%s5211_s0 + $0x5a8] sm:$0xf] }
  0x6d   :  { %1538 = vmatpush.bf16.msrb.mxu0 %v3169_v63  ;;  %v3383_v63 = vld [vmem:[%s5211_s0 + $0x134] sm:$0xf0]  ;;  %v2756_v8 = vld [vmem:[%s5211_s0 + $0x268] sm:$0xf] }
  0x6e   :  { %1631 = vmatpush.bf16.msra.mxu1 %v2949_v9  ;;  %v3061_v9 = vor.u32 %v3499_v1, %v3060_v0  ;;  %v3483_v1 = vld [vmem:[%s5211_s0 + $0x454] sm:$0xf0]  ;;  %v3140_v13 = vld [vmem:[%s5211_s0 + $0x568] sm:$0xf] }
  0x6f   :  { %v2740_v21 = vld [vmem:[%s5211_s0 + $0x248] sm:$0xf]  ;;  %v3475_v26 = vld [vmem:[%s5211_s0 + $0x414] sm:$0xf0] }
  0x70   :  { %1595 = vmatpush.bf16.msrb.mxu3 %v2661_v10  ;;  %1580 = vmatpush.bf16.msrb.mxu2 %v2469_v30  ;;  %v2597_v10 = vor.u32 %v3383_v63, %v2596_v59  ;;  %v3188_v30 = vld [vmem:[%s5211_s0 + $0x5c8] sm:$0xf]  ;;  %v3427_v59 = vld [vmem:[%s5211_s0 + $0x294] sm:$0xf0]  ;;  %v2853_v63 = vor.u32 %v3447_v45, %v2852_v43 }
  0x71   :  { %1539 = vmatpush.bf16.msrb.mxu0 %v3153_v11  ;;  %v3089_v11 = vor.u32 %v3504_v2, %v3086_v3  ;;  %v2836_v2 = vld [vmem:[%s5211_s0 + $0x308] sm:$0xf]  ;;  %v3443_v3 = vld [vmem:[%s5211_s0 + $0x314] sm:$0xf0]  ;;  %v2773_v7 = vor.u32 %v3427_v59, %v2772_v58  ;;  %v3401_v59 = vld [vmem:[%s5211_s0 + $0x1cc] sm:$0xf] }
  0x72   :  { %1632 = vmatpush.bf16.msra.mxu1 %v2933_v19  ;;  %v3535_v19 = vld [vmem:[%s5211_s0 + $0x5f4] sm:$0xf0]  ;;  %v3108_v43 = vld [vmem:[%s5211_s0 + $0x528] sm:$0xf] }
  0x73   :  { %v3205_v28 = vor.u32 %v3535_v19, %v3204_v17  ;;  %v3519_v17 = vld [vmem:[%s5211_s0 + $0x574] sm:$0xf0]  ;;  %v2550_v19 = vld [vmem:[%s5211_s0 + $0xd8] sm:$0xf0] }
  0x74   :  { %1596 = vmatpush.bf16.msrb.mxu3 %v2645_v24  ;;  %1581 = vmatpush.bf16.msrb.mxu2 %v2453_v53  ;;  %v3451_v24 = vld [vmem:[%s5211_s0 + $0x354] sm:$0xf0] }
  0x75   :  { %1540 = vmatpush.bf16.msrb.mxu0 %v3137_v25  ;;  %1511 = vmatmul.bf16.gmra.mxu2 %v3987_v47  ;;  %v2581_v25 = vor.u32 %v3379_v15, %v2580_v14  ;;  %v2869_v32 = vor.u32 %v3451_v24, %v2868_v23  ;;  %v3527_v53 = vld [vmem:[%s5211_s0 + $0x5b4] sm:$0xf0]  ;;  %v2980_v14 = vld [vmem:[%s5211_s0 + $0x428] sm:$0xf]  ;;  %v3141_v24 = vor.u32 %v3519_v17, %v3140_v13  ;;  %v3393_v17 = vld [vmem:[%s5211_s0 + $0x18c] sm:$0xf] }
  0x76   :  { %1633 = vmatpush.bf16.msra.mxu1 %v2917_v31  ;;  %1473 = vmatmul.bf16.gmra.mxu0 %v3974_v41  ;;  %v3531_v31 = vld [vmem:[%s5211_s0 + $0x5d4] sm:$0xf0]  ;;  %v3173_v0 = vor.u32 %v3527_v53, %v3172_v48  ;;  %v2708_v53 = vld [vmem:[%s5211_s0 + $0x208] sm:$0xf] }
  0x77   :  { %1492 = vmatmul.bf16.gmra.mxu1 %v3976_v42  ;;  %1530 = vmatmul.bf16.gmra.mxu3 %v4226_v44  ;;  %v3189_v38 = vor.u32 %v3531_v31, %v3188_v30  ;;  %v3479_v15 = vld [vmem:[%s5211_s0 + $0x434] sm:$0xf0]  ;;  %v2724_v31 = vld [vmem:[%s5211_s0 + $0x228] sm:$0xf] }
  0x78   :  { %1597 = vmatpush.bf16.msrb.mxu3 %v2629_v34  ;;  %1650 = vmatpush.bf16.msra.mxu2 %v3077_v60  ;;  %v2788_v34 = vld [vmem:[%s5211_s0 + $0x2a8] sm:$0xf]  ;;  %v2981_v23 = vor.u32 %v3479_v15, %v2980_v14  ;;  %v3511_v45 = vld [vmem:[%s5211_s0 + $0x534] sm:$0xf0]  ;;  %v3433_v14 = vld [vmem:[%s5211_s0 + $0x2cc] sm:$0xf] }
  0x79   :  { %1541 = vmatpush.bf16.msrb.mxu0 %v3121_v35  ;;  %v3431_v35 = vld [vmem:[%s5211_s0 + $0x2b4] sm:$0xf0]  ;;  %v3156_v60 = vld [vmem:[%s5211_s0 + $0x588] sm:$0xf]  ;;  %v2806_v15 = vld [vmem:[%s5211_s0 + $0x2d8] sm:$0xf0] }
  0x7a   :  { %1634 = vmatpush.bf16.msra.mxu1 %v2901_v5  ;;  %v2789_v54 = vor.u32 %v3431_v35, %v2788_v34  ;;  %v3373_v5 = vld [vmem:[%s5211_s0 + $0xec] sm:$0xf]  ;;  %v3157_v12 = vor.u32 %v3523_v4, %v3156_v60 }
  0x7b   :  { %v3405_v34 = vld [vmem:[%s5211_s0 + $0x1ec] sm:$0xf] }
  0x7c   :  { %1598 = vmatpush.bf16.msrb.mxu3 %v2613_v61  ;;  %1651 = vmatpush.bf16.msra.mxu2 %v3061_v9  ;;  %v3013_v61 = vor.u32 %v3487_v39, %v3012_v37  ;;  %v3423_v9 = vld [vmem:[%s5211_s0 + $0x274] sm:$0xf0]  ;;  %v2694_v37 = vld [vmem:[%s5211_s0 + $0x1f8] sm:$0xf0]  ;;  %v3437_v4 = vld [vmem:[%s5211_s0 + $0x2ec] sm:$0xf] }
  0x7d   :  { %1542 = vmatpush.bf16.msrb.mxu0 %v3105_v62  ;;  %v2996_v62 = vld [vmem:[%s5211_s0 + $0x448] sm:$0xf]  ;;  %v2757_v20 = vor.u32 %v3423_v9, %v2756_v8  ;;  %v2534_v39 = vld [vmem:[%s5211_s0 + $0xb8] sm:$0xf0]  ;;  %v2697_v58 = vor.u32 %v3405_v34, %v2694_v37 }
  0x7e   :  { %1635 = vmatpush.bf16.msra.mxu1 %v2885_v18  ;;  %v3369_v18 = vld [vmem:[%s5211_s0 + $0xcc] sm:$0xf]  ;;  %v2470_v37 = vld [vmem:[%s5211_s0 + $0x38] sm:$0xf0] }
  0x7f   :  { %v2553_v27 = vor.u32 %v3369_v18, %v2550_v19  ;;  %v3236_v19 = vld [vmem:[%s5211_s0 + $0x628] sm:$0xf] }
  0x80   :  { %1599 = vmatpush.bf16.msrb.mxu3 %v2597_v10  ;;  %1652 = vmatpush.bf16.msra.mxu2 %v3045_v22  ;;  %v2997_v10 = vor.u32 %v3483_v1, %v2996_v62  ;;  %v3419_v22 = vld [vmem:[%s5211_s0 + $0x254] sm:$0xf0]  ;;  %v2678_v62 = vld [vmem:[%s5211_s0 + $0x1d8] sm:$0xf0]  ;;  %v3092_v1 = vld [vmem:[%s5211_s0 + $0x508] sm:$0xf] }
  0x81   :  { %1543 = vmatpush.bf16.msrb.mxu0 %v3089_v11  ;;  %v2837_v11 = vor.u32 %v3443_v3, %v2836_v2  ;;  %v2741_v30 = vor.u32 %v3419_v22, %v2740_v21  ;;  %v3507_v2 = vld [vmem:[%s5211_s0 + $0x514] sm:$0xf0]  ;;  %v2646_v21 = vld [vmem:[%s5211_s0 + $0x198] sm:$0xf0]  ;;  %v3353_v22 = vld [vmem:[%s5211_s0 + $0x4c] sm:$0xf] }
  0x82   :  { %1636 = vmatpush.bf16.msra.mxu1 %v2869_v32  ;;  %v3415_v32 = vld [vmem:[%s5211_s0 + $0x234] sm:$0xf0]  ;;  %v3093_v9 = vor.u32 %v3507_v2, %v3092_v1  ;;  %v3501_v2 = vld [vmem:[%s5211_s0 + $0x4ec] sm:$0xf] }
  0x83   :  { %v2725_v48 = vor.u32 %v3415_v32, %v2724_v31  ;;  %v2630_v31 = vld [vmem:[%s5211_s0 + $0x178] sm:$0xf0]  ;;  %v3220_v32 = vld [vmem:[%s5211_s0 + $0x608] sm:$0xf] }
  0x84   :  { %1600 = vmatpush.bf16.msrb.mxu3 %v2581_v25  ;;  %1653 = vmatpush.bf16.msra.mxu2 %v3029_v33  ;;  %v2964_v25 = vld [vmem:[%s5211_s0 + $0x408] sm:$0xf] }
  0x85   :  { %1612 = vmatpush.bf16.msra.mxu0 %v2821_v16  ;;  %1582 = vmatmul.bf16.vlgmr.msrb.gmra.mxu2 %v3843_v46  ;;  %v2569_v16 = vor.u32 %v3373_v5, %v2566_v6  ;;  %v2965_v33 = vor.u32 %v3475_v26, %v2964_v25  ;;  %v2822_v5 = vld [vmem:[%s5211_s0 + $0x2f8] sm:$0xf0]  ;;  %v2681_v6 = vor.u32 %v3401_v59, %v2678_v62  ;;  %v3429_v26 = vld [vmem:[%s5211_s0 + $0x2ac] sm:$0xf] }
  0x86   :  { %1544 = vmatmul.bf16.vlgmr.msrb.gmra.mxu0 %v4112_v49  ;;  %1637 = vmatpush.bf16.msra.mxu1 %v2853_v63  ;;  %v3361_v63 = vld [vmem:[%s5211_s0 + $0x8c] sm:$0xf]  ;;  %v2825_v13 = vor.u32 %v3437_v4, %v2822_v5  ;;  %v2809_v25 = vor.u32 %v3433_v14, %v2806_v15  ;;  %v2614_v59 = vld [vmem:[%s5211_s0 + $0x158] sm:$0xf0] }
  0x87   :  { %3244 = vmatmul.msk.bf16.vlgmr.msrb.gmra.mxu1 %vm1301_vm0, %v4114_v50  ;;  %1601 = vmatmul.bf16.vlgmr.msrb.gmra.mxu3 %v3854_v51  ;;  %v2950_v62 = vld [vmem:[%s5211_s0 + $0x3f8] sm:$0xf0]  ;;  %v3421_v5 = vld [vmem:[%s5211_s0 + $0x26c] sm:$0xf] }
  0x88   :  { %1669 = vmatpush.bf16.msra.mxu3 %v3205_v28  ;;  %1654 = vmatpush.bf16.msra.mxu2 %v3013_v61  ;;  %v3124_v28 = vld [vmem:[%s5211_s0 + $0x548] sm:$0xf]  ;;  %v3109_v61 = vor.u32 %v3511_v45, %v3108_v43 }
  0x89   :  { %1613 = vmatpush.bf16.msra.mxu0 %v2805_v29  ;;  %v3515_v29 = vld [vmem:[%s5211_s0 + $0x554] sm:$0xf0] }
  0x8a   :  { %1638 = vmatpush.bf16.msra.mxu1 %v2837_v11  ;;  %v3125_v35 = vor.u32 %v3515_v29, %v3124_v28  ;;  %v3357_v11 = vld [vmem:[%s5211_s0 + $0x6c] sm:$0xf]  ;;  %v2649_v28 = vor.u32 %v3393_v17, %v2646_v21 }
  0x8b   :  { %v3389_v29 = vld [vmem:[%s5211_s0 + $0x16c] sm:$0xf] }
  0x8c   :  { %1670 = vmatpush.bf16.msra.mxu3 %v3189_v38  ;;  %1655 = vmatpush.bf16.msra.mxu2 %v2997_v10  ;;  %v3365_v38 = vld [vmem:[%s5211_s0 + $0xac] sm:$0xf]  ;;  %v2662_v10 = vld [vmem:[%s5211_s0 + $0x1b8] sm:$0xf0] }
  0x8d   :  { %1614 = vmatpush.bf16.msra.mxu0 %v2789_v54  ;;  %v3411_v54 = vld [vmem:[%s5211_s0 + $0x214] sm:$0xf0]  ;;  %v2537_v60 = vor.u32 %v3365_v38, %v2534_v39  ;;  %v3497_v21 = vld [vmem:[%s5211_s0 + $0x4cc] sm:$0xf] }
  0x8e   :  { %1707 = vmatpush.bf16.msrb.mxu1 %v2569_v16  ;;  %v2709_v3 = vor.u32 %v3411_v54, %v2708_v53  ;;  %v2774_v53 = vld [vmem:[%s5211_s0 + $0x298] sm:$0xf0]  ;;  %v2633_v54 = vor.u32 %v3389_v29, %v2630_v31 }
  0x8f   :  { %v2582_v29 = vld [vmem:[%s5211_s0 + $0x118] sm:$0xf0] }
  0x90   :  { %1671 = vmatpush.bf16.msra.mxu3 %v3173_v0  ;;  %1656 = vmatpush.bf16.msra.mxu2 %v2981_v23  ;;  %v2518_v0 = vld [vmem:[%s5211_s0 + $0x98] sm:$0xf0] }
  0x91   :  { %1615 = vmatpush.bf16.msra.mxu0 %v2773_v7  ;;  %v3397_v7 = vld [vmem:[%s5211_s0 + $0x1ac] sm:$0xf]  ;;  %v2521_v8 = vor.u32 %v3361_v63, %v2518_v0  ;;  %v2486_v23 = vld [vmem:[%s5211_s0 + $0x58] sm:$0xf0] }
  0x92   :  { %1708 = vmatpush.bf16.msrb.mxu1 %v2553_v27  ;;  %v2665_v16 = vor.u32 %v3397_v7, %v2662_v10  ;;  %v2790_v27 = vld [vmem:[%s5211_s0 + $0x2b8] sm:$0xf0]  ;;  %v3345_v63 = vld [vmem:[%s5211_s0 + $0xc] sm:$0xf] }
  0x93   :  { %v2793_v45 = vor.u32 %v3429_v26, %v2790_v27  ;;  %v2454_v0 = vld [vmem:[%s5211_s0 + $0x18] sm:$0xf0] }
  0x94   :  { %1672 = vmatpush.bf16.msra.mxu3 %v3157_v12  ;;  %1657 = vmatpush.bf16.msra.mxu2 %v2965_v33  ;;  %v2502_v12 = vld [vmem:[%s5211_s0 + $0x78] sm:$0xf0]  ;;  %v3539_v33 = vld [vmem:[%s5211_s0 + $0x614] sm:$0xf0] }
  0x95   :  { %1616 = vmatpush.bf16.msra.mxu0 %v2757_v20  ;;  %1587 = vmatmul.bf16.gmra.mxu2 %v3963_v36  ;;  %v2505_v18 = vor.u32 %v3357_v11, %v2502_v12  ;;  %v3543_v20 = vld [vmem:[%s5211_s0 + $0x634] sm:$0xf0]  ;;  %v3221_v39 = vor.u32 %v3539_v33, %v3220_v32  ;;  %v2598_v10 = vld [vmem:[%s5211_s0 + $0x138] sm:$0xf0]  ;;  %v2457_v11 = vor.u32 %v3345_v63, %v2454_v0  ;;  %v3465_v12 = vld [vmem:[%s5211_s0 + $0x3cc] sm:$0xf] }
  0x96   :  { %1549 = vmatmul.bf16.gmra.mxu0 %v4237_v56  ;;  %1709 = vmatpush.bf16.msrb.mxu1 %v2537_v60  ;;  %v2742_v26 = vld [vmem:[%s5211_s0 + $0x258] sm:$0xf0]  ;;  %v3533_v32 = vld [vmem:[%s5211_s0 + $0x5ec] sm:$0xf] }
  0x97   :  { %3245 = vmatmul.msk.bf16.gmra.mxu1 %vm1301_vm0, %v4239_v57  ;;  %1606 = vmatmul.bf16.gmra.mxu3 %v3974_v41  ;;  %v2918_v31 = vld [vmem:[%s5211_s0 + $0x3b8] sm:$0xf0]  ;;  %v3529_v63 = vld [vmem:[%s5211_s0 + $0x5cc] sm:$0xf] }
  0x98   :  { %1673 = vmatpush.bf16.msra.mxu3 %v3141_v24  ;;  %1726 = vmatpush.bf16.msrb.mxu2 %v2697_v58  ;;  %v3237_v24 = vor.u32 %v3543_v20, %v3236_v19  ;;  %v3385_v58 = vld [vmem:[%s5211_s0 + $0x14c] sm:$0xf]  ;;  %v3206_v33 = vld [vmem:[%s5211_s0 + $0x5f8] sm:$0xf0] }
  0x99   :  { %1617 = vmatpush.bf16.msra.mxu0 %v2741_v30  ;;  %v2489_v30 = vor.u32 %v3353_v22, %v2486_v23  ;;  %v2617_v7 = vor.u32 %v3385_v58, %v2614_v59  ;;  %v3062_v22 = vld [vmem:[%s5211_s0 + $0x4d8] sm:$0xf0]  ;;  %v3457_v58 = vld [vmem:[%s5211_s0 + $0x38c] sm:$0xf] }
  0x9a   :  { %1710 = vmatpush.bf16.msrb.mxu1 %v2521_v8  ;;  %v3381_v8 = vld [vmem:[%s5211_s0 + $0x12c] sm:$0xf]  ;;  %v2902_v59 = vld [vmem:[%s5211_s0 + $0x398] sm:$0xf0] }
  0x9b   :  { %v2601_v27 = vor.u32 %v3381_v8, %v2598_v10  ;;  %v3190_v0 = vld [vmem:[%s5211_s0 + $0x5d8] sm:$0xf0]  ;;  %v3489_v8 = vld [vmem:[%s5211_s0 + $0x48c] sm:$0xf] }
  0x9c   :  { %1674 = vmatpush.bf16.msra.mxu3 %v3125_v35  ;;  %1727 = vmatpush.bf16.msrb.mxu2 %v2681_v6  ;;  %v3349_v35 = vld [vmem:[%s5211_s0 + $0x2c] sm:$0xf]  ;;  %v2758_v6 = vld [vmem:[%s5211_s0 + $0x278] sm:$0xf0] }
  0x9d   :  { %1618 = vmatpush.bf16.msra.mxu0 %v2725_v48  ;;  %v3425_v48 = vld [vmem:[%s5211_s0 + $0x28c] sm:$0xf]  ;;  %v2473_v60 = vor.u32 %v3349_v35, %v2470_v37  ;;  %v2761_v20 = vor.u32 %v3421_v5, %v2758_v6  ;;  %v2710_v10 = vld [vmem:[%s5211_s0 + $0x218] sm:$0xf0] }
  0x9e   :  { %1711 = vmatpush.bf16.msrb.mxu1 %v2505_v18  ;;  %v2777_v4 = vor.u32 %v3425_v48, %v2774_v53  ;;  %v3413_v37 = vld [vmem:[%s5211_s0 + $0x22c] sm:$0xf]  ;;  %v3046_v48 = vld [vmem:[%s5211_s0 + $0x4b8] sm:$0xf0] }
  0x9f   :  { %v3409_v6 = vld [vmem:[%s5211_s0 + $0x20c] sm:$0xf] }
  0xa0   :  { %1675 = vmatpush.bf16.msra.mxu3 %v3109_v61  ;;  %1728 = vmatpush.bf16.msrb.mxu2 %v2665_v16  ;;  %v3469_v61 = vld [vmem:[%s5211_s0 + $0x3ec] sm:$0xf] }
  0xa1   :  { %1619 = vmatpush.bf16.msra.mxu0 %v2709_v3  ;;  %v1317_v34 = vpop.f32.mrf.mxu0  ;;  %v2953_v1 = vor.u32 %v3469_v61, %v2950_v62  ;;  %v3078_v3 = vld [vmem:[%s5211_s0 + $0x4f8] sm:$0xf0] }
  0xa2   :  { %1712 = vmatpush.bf16.msrb.mxu1 %v2489_v30  ;;  %v3081_v17 = vor.u32 %v3501_v2, %v3078_v3  ;;  %v3461_v30 = vld [vmem:[%s5211_s0 + $0x3ac] sm:$0xf] }
  0xa3   :  { %v2921_v35 = vor.u32 %v3461_v30, %v2918_v31  ;;  %v3158_v30 = vld [vmem:[%s5211_s0 + $0x598] sm:$0xf0] }
  0xa4   :  { %1676 = vmatpush.bf16.msra.mxu3 %v3093_v9  ;;  %v1336_v38 = vpop.f32.mrf.mxu1  ;;  %1729 = vmatpush.bf16.msrb.mxu2 %v2649_v28  ;;  %v3377_v28 = vld [vmem:[%s5211_s0 + $0x10c] sm:$0xf] }
  0xa5   :  { %1694 = vmatpush.bf16.msrb.mxu0 %v3237_v24  ;;  %v1337_v43 = vadd.f32 %v1336_v38, %v1317_v34  ;;  %1658 = vmatmul.bf16.vlgmr.msra.gmra.mxu2 %v4101_v40  ;;  %v3065_v34 = vor.u32 %v3497_v21, %v3062_v22 }
  0xa6   :  { %1620 = vmatmul.bf16.vlgmr.msra.gmra.mxu0 %v3856_v52  ;;  %1713 = vmatpush.bf16.msrb.mxu1 %v2473_v60 }
  0xa7   :  { %1639 = vmatmul.bf16.vlgmr.msra.gmra.mxu1 %v3864_v55  ;;  %1677 = vmatmul.bf16.vlgmr.msra.gmra.mxu3 %v4112_v49 }
  0xa8   :  { %1745 = vmatpush.bf16.msrb.mxu3 %v2825_v13  ;;  %1730 = vmatpush.bf16.msrb.mxu2 %v2633_v54  ;;  %v1355_v9 = vpop.f32.mrf.mxu2  ;;  %v2934_v13 = vld [vmem:[%s5211_s0 + $0x3d8] sm:$0xf0]  ;;  %v3209_v54 = vor.u32 %v3533_v32, %v3206_v33 }
  0xa9   :  { %1695 = vmatpush.bf16.msrb.mxu0 %v3221_v39  ;;  %v1356_v14 = vadd.f32 %v1355_v9, %v1337_v43  ;;  %v1374_v15 = vpop.f32.mrf.mxu3  ;;  %v1319_v16 = vpop.f32.mrf.mxu0  ;;  %v2937_v18 = vor.u32 %v3465_v12, %v2934_v13  ;;  %v2726_v39 = vld [vmem:[%s5211_s0 + $0x238] sm:$0xf0]  ;;  %v2585_v43 = vor.u32 %v3377_v28, %v2582_v29  ;;  %v3453_v12 = vld [vmem:[%s5211_s0 + $0x36c] sm:$0xf] }
  0xaa   :  { %1714 = vmatpush.bf16.msrb.mxu1 %v2457_v11  ;;  %v2729_v2 = vor.u32 %v3413_v37, %v2726_v39  ;;  %v3030_v9 = vld [vmem:[%s5211_s0 + $0x498] sm:$0xf0]  ;;  %v3193_v11 = vor.u32 %v3529_v63, %v3190_v0  ;;  %v3521_v29 = vld [vmem:[%s5211_s0 + $0x58c] sm:$0xf] }
  0xab   :  { %v4808_v23 = vadd.f32 %v1374_v15, %v1356_v14  ;;  %v2886_v13 = vld [vmem:[%s5211_s0 + $0x378] sm:$0xf0]  ;;  %v3525_v14 = vld [vmem:[%s5211_s0 + $0x5ac] sm:$0xf]  ;;  %v3161_v39 = vor.u32 %v3521_v29, %v3158_v30 }
  0xac   :  { %1746 = vmatpush.bf16.msrb.mxu3 %v2809_v25  ;;  %v1338_v19 = vpop.f32.mrf.mxu1  ;;  %1731 = vmatpush.bf16.msrb.mxu2 %v2617_v7  ;;  %v3417_v25 = vld [vmem:[%s5211_s0 + $0x24c] sm:$0xf]  ;;  %v2905_v7 = vor.u32 %v3457_v58, %v2902_v59  ;;  %v3174_v15 = vld [vmem:[%s5211_s0 + $0x5b8] sm:$0xf0] }
  0xad   :  { %1764 = vmatpush.bf16.msra.mxu0 %v2953_v1  ;;  %v1339_v24 = vadd.f32 %v1338_v19, %v1319_v16  ;;  %v2745_v38 = vor.u32 %v3417_v25, %v2742_v26  ;;  %v3033_v16 = vor.u32 %v3489_v8, %v3030_v9  ;;  %v3485_v19 = vld [vmem:[%s5211_s0 + $0x46c] sm:$0xf]  ;;  %v3177_v22 = vor.u32 %v3525_v14, %v3174_v15  ;;  %v2870_v25 = vld [vmem:[%s5211_s0 + $0x358] sm:$0xf0] }
  0xae   :  { %1783 = vmatpush.bf16.msra.mxu1 %v3081_v17  ;;  %v2713_v17 = vor.u32 %v3409_v6, %v2710_v10  ;;  %v3481_v37 = vld [vmem:[%s5211_s0 + $0x44c] sm:$0xf]  ;;  %v2854_v59 = vld [vmem:[%s5211_s0 + $0x338] sm:$0xf0] }
  0xaf   :  { %v2982_v63 = vld [vmem:[%s5211_s0 + $0x438] sm:$0xf0]  ;;  %v3513_v8 = vld [vmem:[%s5211_s0 + $0x54c] sm:$0xf] }
  0xb0   :  { %1747 = vmatpush.bf16.msrb.mxu3 %v2793_v45  ;;  %1732 = vmatpush.bf16.msrb.mxu2 %v2601_v27  ;;  %v3493_v45 = vld [vmem:[%s5211_s0 + $0x4ac] sm:$0xf]  ;;  %v1357_v53 = vpop.f32.mrf.mxu2  ;;  %v3126_v9 = vld [vmem:[%s5211_s0 + $0x558] sm:$0xf0] }
  0xb1   :  { %1765 = vmatpush.bf16.msra.mxu0 %v2937_v18  ;;  %v1358_v60 = vadd.f32 %v1357_v53, %v1339_v24  ;;  %v1376_v61 = vpop.f32.mrf.mxu3  ;;  %v1322_v62 = vpop.f32.mrf.mxu0  ;;  %v3049_v3 = vor.u32 %v3493_v45, %v3046_v48  ;;  %v2889_v18 = vor.u32 %v3453_v12, %v2886_v13  ;;  %v3449_v24 = vld [vmem:[%s5211_s0 + $0x34c] sm:$0xf]  ;;  %v3238_v45 = vld [vmem:[%s5211_s0 + $0x638] sm:$0xf0] }
  0xb2   :  { %1784 = vmatpush.bf16.msra.mxu1 %v3065_v34  ;;  %v3445_v48 = vld [vmem:[%s5211_s0 + $0x32c] sm:$0xf]  ;;  %v3222_v14 = vld [vmem:[%s5211_s0 + $0x618] sm:$0xf0] }
  0xb3   :  { %v3517_v53 = vld [vmem:[%s5211_s0 + $0x56c] sm:$0xf] }
  0xb4   :  { %1748 = vmatpush.bf16.msrb.mxu3 %v2777_v4  ;;  %v1341_v1 = vpop.f32.mrf.mxu1  ;;  %v4858_v4 = vadd.f32 %v1376_v61, %v1358_v60  ;;  %1733 = vmatpush.bf16.msrb.mxu2 %v2585_v43  ;;  %v3541_v43 = vld [vmem:[%s5211_s0 + $0x62c] sm:$0xf]  ;;  %v2857_v61 = vor.u32 %v3445_v48, %v2854_v59 }
  0xb5   :  { %1766 = vmatpush.bf16.msra.mxu0 %v2921_v35  ;;  %v1342_v5 = vadd.f32 %v1341_v1, %v1322_v62  ;;  %1663 = vmatmul.bf16.gmra.mxu2 %v4226_v44  ;;  %v2873_v35 = vor.u32 %v3449_v24, %v2870_v25  ;;  %v3241_v58 = vor.u32 %v3541_v43, %v3238_v45  ;;  %v3477_v62 = vld [vmem:[%s5211_s0 + $0x42c] sm:$0xf] }
  0xb6   :  { %1625 = vmatmul.bf16.gmra.mxu0 %v3976_v42  ;;  %1785 = vmatpush.bf16.msra.mxu1 %v3049_v3  ;;  %v2838_v3 = vld [vmem:[%s5211_s0 + $0x318] sm:$0xf0]  ;;  %v2985_v12 = vor.u32 %v3477_v62, %v2982_v63  ;;  %v3537_v13 = vld [vmem:[%s5211_s0 + $0x60c] sm:$0xf] }
  0xb7   :  { %1644 = vmatmul.bf16.gmra.mxu1 %v3987_v47  ;;  %1682 = vmatmul.bf16.gmra.mxu3 %v4237_v56 }
  0xb8   :  { %1749 = vmatpush.bf16.msrb.mxu3 %v2761_v20  ;;  %1802 = vmatpush.bf16.msra.mxu2 %v3209_v54  ;;  %v3014_v20 = vld [vmem:[%s5211_s0 + $0x478] sm:$0xf0]  ;;  %v1360_v21 = vpop.f32.mrf.mxu2 }
  0xb9   :  { %1767 = vmatpush.bf16.msra.mxu0 %v2905_v7  ;;  %v1361_v26 = vadd.f32 %v1360_v21, %v1342_v5  ;;  %v1379_v27 = vpop.f32.mrf.mxu3  ;;  %v1324_v28 = vpop.f32.mrf.mxu0  ;;  %v3017_v32 = vor.u32 %v3485_v19, %v3014_v20  ;;  %v3142_v54 = vld [vmem:[%s5211_s0 + $0x578] sm:$0xf0]  ;;  %v3129_v20 = vor.u32 %v3513_v8, %v3126_v9  ;;  %v3509_v21 = vld [vmem:[%s5211_s0 + $0x52c] sm:$0xf] }
  0xba   :  { %1786 = vmatpush.bf16.msra.mxu1 %v3033_v16  ;;  %v3145_v1 = vor.u32 %v3517_v53, %v3142_v54 }
  0xbb   :  { %v4906_v33 = vadd.f32 %v1379_v27, %v1361_v26 }
  0xbc   :  { %1750 = vmatpush.bf16.msrb.mxu3 %v2745_v38  ;;  %1803 = vmatpush.bf16.msra.mxu2 %v3193_v11  ;;  %v1343_v31 = vpop.f32.mrf.mxu1  ;;  %v2998_v38 = vld [vmem:[%s5211_s0 + $0x458] sm:$0xf0] }
  0xbd   :  { %v1344_v34 = vadd.f32 %v1343_v31, %v1324_v28  ;;  %1768 = vmatpush.bf16.msra.mxu0 %v2889_v18  ;;  %v3001_v60 = vor.u32 %v3481_v37, %v2998_v38  ;;  %v3225_v18 = vor.u32 %v3537_v13, %v3222_v14  ;;  %v3505_v28 = vld [vmem:[%s5211_s0 + $0x50c] sm:$0xf] }
  0xbe   :  { %1787 = vmatpush.bf16.msra.mxu1 %v3017_v32 }
  0xc0   :  { %1751 = vmatpush.bf16.msrb.mxu3 %v2729_v2  ;;  %1804 = vmatpush.bf16.msra.mxu2 %v3177_v22  ;;  %v1362_v0 = vpop.f32.mrf.mxu2  ;;  %v3441_v2 = vld [vmem:[%s5211_s0 + $0x30c] sm:$0xf]  ;;  %v3110_v22 = vld [vmem:[%s5211_s0 + $0x538] sm:$0xf0] }
  0xc1   :  { %1769 = vmatpush.bf16.msra.mxu0 %v2873_v35  ;;  %v1363_v5 = vadd.f32 %v1362_v0, %v1344_v34  ;;  %v1381_v6 = vpop.f32.mrf.mxu3  ;;  %v1393_v7 = vpop.f32.mrf.mxu0  ;;  %v2841_v16 = vor.u32 %v3441_v2, %v2838_v3  ;;  %v3113_v26 = vor.u32 %v3509_v21, %v3110_v22 }
  0xc2   :  { %v1394_v10 = vadd.f32 %v1393_v7, %v4808_v23  ;;  %1788 = vmatpush.bf16.msra.mxu1 %v3001_v60  ;;  %v2966_v23 = vld [vmem:[%s5211_s0 + $0x418] sm:$0xf0] }
  0xc3   :  { %v4957_v15 = vadd.f32 %v1381_v6, %v1363_v5 }
  0xc4   :  { %1752 = vmatpush.bf16.msrb.mxu3 %v2713_v17  ;;  %1805 = vmatpush.bf16.msra.mxu2 %v3161_v39  ;;  %v1412_v11 = vpop.f32.mrf.mxu1  ;;  %v3473_v17 = vld [vmem:[%s5211_s0 + $0x40c] sm:$0xf] }
  0xc5   :  { %1770 = vmatpush.bf16.msra.mxu0 %v2857_v61  ;;  %v1413_v19 = vadd.f32 %v1412_v11, %v1394_v10  ;;  %1734 = vmatmul.bf16.vlgmr.msrb.gmra.mxu2 %v3854_v51  ;;  %v2969_v24 = vor.u32 %v3473_v17, %v2966_v23 }
  0xc6   :  { %3246 = vmatmul.msk.bf16.vlgmr.msrb.gmra.mxu0 %vm1301_vm0, %v4114_v50  ;;  %1789 = vmatpush.bf16.msra.mxu1 %v2985_v12 }
  0xc7   :  { %1715 = vmatmul.bf16.vlgmr.msrb.gmra.mxu1 %v3843_v46  ;;  %1753 = vmatmul.bf16.vlgmr.msrb.gmra.mxu3 %v3856_v52  ;;  %v3094_v52 = vld [vmem:[%s5211_s0 + $0x518] sm:$0xf0]  ;;  %s3577_s0 = smov 114  }
  0xc8   :  { %1827 = vmatpush.bf16.msra.mxu3 %v3241_v58  ;;  %1806 = vmatpush.bf16.msra.mxu2 %v3145_v1  ;;  %v1431_v25 = vpop.f32.mrf.mxu2  ;;  %v3097_v30 = vor.u32 %v3505_v28, %v3094_v52 }
  0xc9   :  { %1771 = vmatpush.bf16.msra.mxu0 %v2841_v16  ;;  %v4976_v46 = vadd.f32 %v1431_v25, %v1413_v19  ;;  %v4978_v27 = vpop.f32.mrf.mxu0 }
  0xca   :  { %v1450_v51 = vpop.f32.mrf.mxu3  ;;  %1790 = vmatpush.bf16.msra.mxu1 %v2969_v24 }
  0xcc   :  { %1828 = vmatpush.bf16.msra.mxu3 %v3225_v18  ;;  %1807 = vmatpush.bf16.msra.mxu2 %v3129_v20  ;;  %v4986_v29 = vpop.f32.mrf.mxu1 }
  0xd0   :  { %1808 = vmatpush.bf16.msra.mxu2 %v3113_v26  ;;  %v4988_v31 = vpop.f32.mrf.mxu2 }
  0xd2   :  { %v1452_v32 = vpop.f32.mrf.mxu3 }
  0xd3   :  { %v1398_v34 = vpop.f32.mrf.mxu0 }
  0xd4   :  { %1809 = vmatpush.bf16.msra.mxu2 %v3097_v30  ;;  %v1399_v35 = vadd.f32 %v1398_v34, %v4906_v33  ;;  %v1417_v37 = vpop.f32.mrf.mxu1 }
  0xd5   :  { %1739 = vmatmul.bf16.gmra.mxu2 %v3974_v41 }
  0xd6   :  { %v1418_v38 = vadd.f32 %v1417_v37, %v1399_v35  ;;  %3247 = vmatmul.msk.bf16.gmra.mxu0 %vm1301_vm0, %v4239_v57 }
  0xd7   :  { %1720 = vmatmul.bf16.gmra.mxu1 %v3963_v36  ;;  %1758 = vmatmul.bf16.gmra.mxu3 %v3976_v42 }
  0xd8   :  { %v1436_v39 = vpop.f32.mrf.mxu2 }
  0xd9   :  { %v4996_v43 = vadd.f32 %v1436_v39, %v1418_v38 }
  0xda   :  { %v1455_v45 = vpop.f32.mrf.mxu3 }
  0xdb   :  { %v4998_v48 = vpop.f32.mrf.mxu0 }
  0xdc   :  { %v5000_v53 = vpop.f32.mrf.mxu1 }
  0xe0   :  { %v5002_v33 = vpop.f32.mrf.mxu2 }
  0xe2   :  { %v1457_v54 = vpop.f32.mrf.mxu3 }
  0xe3   :  { %v1469_v58 = vpop.f32.mrf.mxu0 }
  0xe4   :  { %v1470_v59 = vadd.f32 %v1469_v58, %v1450_v51  ;;  %v1488_v60 = vpop.f32.mrf.mxu1 }
  0xe5   :  { %1810 = vmatmul.bf16.vlgmr.msra.gmra.mxu2 %v4112_v49 }
  0xe6   :  { %v1489_v61 = vadd.f32 %v1488_v60, %v1470_v59  ;;  %1772 = vmatmul.bf16.vlgmr.msra.gmra.mxu0 %v3864_v55 }
  0xe7   :  { %1791 = vmatmul.bf16.vlgmr.msra.gmra.mxu1 %v4101_v40  ;;  %3248 = vmatmul.msk.bf16.vlgmr.msra.gmra.mxu3 %vm1301_vm0, %v4114_v50 }
  0xe8   :  { %v1507_v36 = vpop.f32.mrf.mxu2 }
  0xe9   :  { %v1508_v41 = vadd.f32 %v1507_v36, %v1489_v61 }
  0xea   :  { %v1526_v42 = vpop.f32.mrf.mxu3 }
  0xeb   :  { %v1471_v62 = vpop.f32.mrf.mxu0  ;;  %v1527_v0 = vadd.f32 %v1526_v42, %v1508_v41 }
  0xec   :  { %v1490_v63 = vpop.f32.mrf.mxu1  ;;  %v1472_v10 = vadd.f32 %v1471_v62, %v1452_v32 }
  0xee   :  { %v1491_v14 = vadd.f32 %v1490_v63, %v1472_v10 }
  0xf0   :  { %v1509_v1 = vpop.f32.mrf.mxu2 }
  0xf1   :  { %v1510_v17 = vadd.f32 %v1509_v1, %v1491_v14 }
  0xf2   :  { %v1528_v2 = vpop.f32.mrf.mxu3 }
  0xf3   :  { %v1474_v3 = vpop.f32.mrf.mxu0  ;;  %v1529_v23 = vadd.f32 %v1528_v2, %v1510_v17 }
  0xf4   :  { %v1475_v5 = vadd.f32 %v1474_v3, %v1455_v45  ;;  %v1493_v6 = vpop.f32.mrf.mxu1 }
  0xf5   :  { %1815 = vmatmul.bf16.gmra.mxu2 %v4237_v56  ;;  %v1396_v56 = vadd.f32 %v4978_v27, %v4858_v4 }
  0xf6   :  { %v1494_v7 = vadd.f32 %v1493_v6, %v1475_v5  ;;  %1777 = vmatmul.bf16.gmra.mxu0 %v3987_v47 }
  0xf7   :  { %1796 = vmatmul.bf16.gmra.mxu1 %v4226_v44  ;;  %3249 = vmatmul.msk.bf16.gmra.mxu3 %vm1301_vm0, %v4239_v57  ;;  %v1415_v21 = vadd.f32 %v4986_v29, %v1396_v56 }
  0xf8   :  { %v1512_v55 = vpop.f32.mrf.mxu2 }
  0xf9   :  { %v1513_v40 = vadd.f32 %v1512_v55, %v1494_v7  ;;  %v5022_v26 = vadd.f32 %v4988_v31, %v1415_v21  ;;  %v1401_v31 = vadd.f32 %v4998_v48, %v4957_v15 }
  0xfa   :  { %v1531_v49 = vpop.f32.mrf.mxu3 }
  0xfb   :  { %v1476_v50 = vpop.f32.mrf.mxu0  ;;  %v1532_v9 = vadd.f32 %v1531_v49, %v1513_v40  ;;  %v1420_v60 = vadd.f32 %v5000_v53, %v1401_v31 }
  0xfc   :  { %v1495_v8 = vpop.f32.mrf.mxu1  ;;  %v1477_v28 = vadd.f32 %v1476_v50, %v1457_v54 }
  0xfd   :  { %v5038_v42 = vadd.f32 %v5002_v33, %v1420_v60 }
  0xfe   :  { %v1496_v32 = vadd.f32 %v1495_v8, %v1477_v28 }
 0x100   :  { %v1514_v11 = vpop.f32.mrf.mxu2 }
 0x101   :  { %v1515_v37 = vadd.f32 %v1514_v11, %v1496_v32 }
 0x102   :  { %v1533_v12 = vpop.f32.mrf.mxu3 }
 0x103   :  { %v1545_v13 = vpop.f32.mrf.mxu0  ;;  %v1534_v45 = vadd.f32 %v1533_v12, %v1515_v37 }
 0x104   :  { %v1546_v16 = vadd.f32 %v1545_v13, %v1527_v0  ;;  %v1564_v47 = vpop.f32.mrf.mxu1 }
 0x106   :  { %v5014_v44 = vadd.f32 %v1564_v47, %v1546_v16 }
 0x108   :  { %v1840_v57 = vmax.f32 %v4976_v46, %v5014_v44  ;;  %v1583_v18 = vpop.f32.mrf.mxu2 }
 0x10a   :  { %v1602_v19 = vpop.f32.mrf.mxu3 }
 0x10b   :  { %v1547_v20 = vpop.f32.mrf.mxu0  ;;  %v1603_v22 = vadd.f32 %v1602_v19, %v1583_v18 }
 0x10c   :  { %v1548_v24 = vadd.f32 %v1547_v20, %v1529_v23  ;;  %v1566_v25 = vpop.f32.mrf.mxu1 }
 0x10e   :  { %v5024_v51 = vadd.f32 %v1566_v25, %v1548_v24 }
 0x110   :  { %v1841_v4 = vmax.f32 %v5022_v26, %v5024_v51  ;;  %v1585_v27 = vpop.f32.mrf.mxu2 }
 0x112   :  { %v1604_v52 = vpop.f32.mrf.mxu3 }
 0x113   :  { %v1550_v30 = vpop.f32.mrf.mxu0  ;;  %v5028_v34 = vadd.f32 %v1604_v52, %v1585_v27 }
 0x114   :  { %v1551_v35 = vadd.f32 %v1550_v30, %v1532_v9  ;;  %v1569_v29 = vpop.f32.mrf.mxu1 }
 0x116   :  { %v5030_v38 = vadd.f32 %v1569_v29, %v1551_v35 }
 0x118   :  { %v1842_v39 = vmax.f32 %v4996_v43, %v5030_v38  ;;  %v1588_v54 = vpop.f32.mrf.mxu2 }
 0x11a   :  { %v1607_v58 = vpop.f32.mrf.mxu3 }
 0x11b   :  { %v1552_v59 = vpop.f32.mrf.mxu0  ;;  %v1608_v61 = vadd.f32 %v1607_v58, %v1588_v54 }
 0x11c   :  { %v1553_v36 = vadd.f32 %v1552_v59, %v1534_v45  ;;  %v1571_v41 = vpop.f32.mrf.mxu1 }
 0x11e   :  { %v5040_v62 = vadd.f32 %v1571_v41, %v1553_v36 }
 0x120   :  { %v1843_v15 = vmax.f32 %v5038_v42, %v5040_v62  ;;  %v1590_v48 = vpop.f32.mrf.mxu2 }
 0x122   :  { %v1609_v63 = vpop.f32.mrf.mxu3 }
 0x123   :  { %v1621_v0 = vpop.f32.mrf.mxu0  ;;  %v5044_v1 = vadd.f32 %v1609_v63, %v1590_v48 }
 0x124   :  { %v1622_v2 = vadd.f32 %v1621_v0, %v1603_v22  ;;  %v1640_v3 = vpop.f32.mrf.mxu1 }
 0x126   :  { %v1641_v5 = vadd.f32 %v1640_v3, %v1622_v2 }
 0x128   :  { %v1659_v53 = vpop.f32.mrf.mxu2 }
 0x129   :  { %v1660_v6 = vadd.f32 %v1659_v53, %v1641_v5 }
 0x12a   :  { %v1678_v7 = vpop.f32.mrf.mxu3 }
 0x12b   :  { %v1623_v55 = vpop.f32.mrf.mxu0  ;;  %v1679_v33 = vadd.f32 %v1678_v7, %v1660_v6 }
 0x12c   :  { %v1642_v40 = vpop.f32.mrf.mxu1  ;;  %v1624_v36 = vadd.f32 %v1623_v55, %v5028_v34 }
 0x12e   :  { %v1643_v5 = vadd.f32 %v1642_v40, %v1624_v36 }
 0x130   :  { %v1661_v49 = vpop.f32.mrf.mxu2 }
 0x132   :  { %v1680_v50 = vpop.f32.mrf.mxu3 }
 0x133   :  { %v1626_v8 = vpop.f32.mrf.mxu0 }
 0x134   :  { %v1627_v9 = vadd.f32 %v1626_v8, %v1608_v61  ;;  %v1645_v10 = vpop.f32.mrf.mxu1 }
 0x136   :  { %v1646_v11 = vadd.f32 %v1645_v10, %v1627_v9  ;;  %v1662_v9 = vadd.f32 %v1661_v49, %v1643_v5 }
 0x138   :  { %v1664_v12 = vpop.f32.mrf.mxu2  ;;  %v1681_v34 = vadd.f32 %v1680_v50, %v1662_v9 }
 0x139   :  { %v1665_v13 = vadd.f32 %v1664_v12, %v1646_v11 }
 0x13a   :  { %v1683_v14 = vpop.f32.mrf.mxu3 }
 0x13b   :  { %v1628_v16 = vpop.f32.mrf.mxu0  ;;  %v5048_v17 = vadd.f32 %v1683_v14, %v1665_v13 }
 0x13c   :  { %v5046_v47 = vpop.f32.mrf.mxu1 }
 0x140   :  { %v5050_v56 = vpop.f32.mrf.mxu2 }
 0x142   :  { %v5052_v23 = vpop.f32.mrf.mxu3 }
 0x143   :  { %v1697_v18 = vpop.f32.mrf.mxu0 }
 0x144   :  { %v1716_v19 = vpop.f32.mrf.mxu1  ;;  %v1698_v6 = vadd.f32 %v1697_v18, %v1679_v33 }
 0x148   :  { %v1735_v20 = vpop.f32.mrf.mxu2 }
 0x149   :  { %v1736_v37 = vadd.f32 %v1735_v20, %v1716_v19 }
 0x14a   :  { %v1754_v21 = vpop.f32.mrf.mxu3 }
 0x14b   :  { %v1699_v22 = vpop.f32.mrf.mxu0  ;;  %v1755_v45 = vadd.f32 %v1754_v21, %v1736_v37 }
 0x14c   :  { %v1718_v24 = vpop.f32.mrf.mxu1 }
 0x150   :  { %v1737_v25 = vpop.f32.mrf.mxu2 }
 0x151   :  { %v1738_v61 = vadd.f32 %v1737_v25, %v1718_v24  ;;  %v1700_v24 = vadd.f32 %v1699_v22, %v1681_v34  ;;  %v3262_v34 = vld [vmem:[%s5213_s2 + $0x10] sm:$0xf] }
 0x152   :  { %v1756_v28 = vpop.f32.mrf.mxu3 }
 0x153   :  { %v1702_v27 = vpop.f32.mrf.mxu0  ;;  %v1757_v63 = vadd.f32 %v1756_v28, %v1738_v61  ;;  %v1629_v28 = vadd.f32 %v1628_v16, %v5044_v1 }
 0x154   :  { %v1721_v52 = vpop.f32.mrf.mxu1 }
 0x158   :  { %v1740_v30 = vpop.f32.mrf.mxu2 }
 0x159   :  { %v1741_v10 = vadd.f32 %v1740_v30, %v1721_v52  ;;  %v3576_v52 = vmov -1.0  }
 0x15a   :  { %v1759_v32 = vpop.f32.mrf.mxu3 }
 0x15b   :  { %v5054_v35 = vpop.f32.mrf.mxu0  ;;  %v1760_v14 = vadd.f32 %v1759_v32, %v1741_v10 }
 0x15c   :  { %v1723_v29 = vpop.f32.mrf.mxu1 }
 0x160   :  { %v1742_v31 = vpop.f32.mrf.mxu2 }
 0x161   :  { %v1743_v25 = vadd.f32 %v1742_v31, %v1723_v29  ;;  %v1703_v31 = vadd.f32 %v1702_v27, %v5048_v17 }
 0x162   :  { %v1761_v54 = vpop.f32.mrf.mxu3 }
 0x163   :  { %v1773_v58 = vpop.f32.mrf.mxu0  ;;  %v1762_v50 = vadd.f32 %v1761_v54, %v1743_v25  ;;  %v3545_v25 = vld [vmem:[%s5213_s2 + $0x8] sm:$0x10] }
 0x164   :  { %v1792_v59 = vpop.f32.mrf.mxu1  ;;  %v1774_v60 = vadd.f32 %v1773_v58, %v1755_v45  ;;  %v1648_v58 = vadd.f32 %v5046_v47, %v1629_v28 }
 0x166   :  { %v1793_v41 = vadd.f32 %v1792_v59, %v1774_v60  ;;  %v1667_v60 = vadd.f32 %v5050_v56, %v1648_v58  ;;  %v3272_v58 = vld [vmem:[%s5213_s2 + $0x20] sm:$0xf] }
 0x168   :  { %v1811_v48 = vpop.f32.mrf.mxu2 }
 0x169   :  { %v1812_v0 = vadd.f32 %v1811_v48, %v1793_v41  ;;  %v1686_v48 = vadd.f32 %v5052_v23, %v1667_v60 }
 0x16a   :  { %v1830_v2 = vpop.f32.mrf.mxu3 }
 0x16b   :  { %v1775_v3 = vpop.f32.mrf.mxu0  ;;  %v1831_v7 = vadd.f32 %v1830_v2, %v1812_v0  ;;  %v1705_v27 = vadd.f32 %v5054_v35, %v1686_v48 }
 0x16c   :  { %v1794_v53 = vpop.f32.mrf.mxu1  ;;  %v1776_v8 = vadd.f32 %v1775_v3, %v1757_v63 }
 0x16d   :  { %v1844_v11 = vmax.f32 %v1698_v6, %v1831_v7 }
 0x16e   :  { %v1795_v13 = vadd.f32 %v1794_v53, %v1776_v8  ;;  %v3544_v53 = vld [vmem:[%s5213_s2] sm:$0x10] }
 0x16f   :  { %v1848_v12 = vmax.f32 %v1840_v57, %v1844_v11 }
 0x170   :  { %v1813_v55 = vpop.f32.mrf.mxu2 }
 0x171   :  { %v1814_v19 = vadd.f32 %v1813_v55, %v1795_v13  ;;  %vm1852_vm1 = vcmp.ge.f32.partialorder %v1848_v12, 0.0  ;;  %v3546_v55 = vld [vmem:[%s5213_s2 + $0x10] sm:$0x10] }
 0x172   :  { %v1832_v20 = vpop.f32.mrf.mxu3  ;;  %v1856_v30 = vsel %vm1852_vm1, 1.0, %v3576_v52 }
 0x173   :  { %v1778_v21 = vpop.f32.mrf.mxu0  ;;  %v1833_v40 = vadd.f32 %v1832_v20, %v1814_v19  ;;  %v1860_v32 = vpack.c.bf16 %v1856_v30, %v1856_v30  ;;  %v3547_v19 = vld [vmem:[%s5213_s2 + $0x18] sm:$0x10] }
 0x174   :  { %v1779_v33 = vadd.f32 %v1778_v21, %v1760_v14  ;;  %v1797_v18 = vpop.f32.mrf.mxu1  ;;  %v3267_v14 = vld [vmem:[%s5213_s2 + $0x18] sm:$0xf]  ;;  %v3263_v21 = vor.u32 %v3546_v55, %v3262_v34 }
 0x175   :  { %v1845_v49 = vmax.f32 %v1700_v24, %v1833_v40  ;;  %v1905_v26 = vunpack.c.l.b16 %v1860_v32  ;;  %v3268_v24 = vor.u32 %v3547_v19, %v3267_v14 }
 0x176   :  { %v1798_v44 = vadd.f32 %v1797_v18, %v1779_v33  ;;  %v3252_v18 = vld [vmem:[%s5213_s2 + $0x8] sm:$0xf] }
 0x177   :  { %v1849_v46 = vmax.f32 %v1841_v4, %v1845_v49  ;;  %v3253_v49 = vor.u32 %v3545_v25, %v3252_v18 }
 0x178   :  { %v1816_v57 = vpop.f32.mrf.mxu2 }
 0x179   :  { %vm1853_vm2 = vcmp.ge.f32.partialorder %v1849_v46, 0.0  ;;  %v1817_v22 = vadd.f32 %v1816_v57, %v1798_v44  ;;  %v3282_v46 = vld [vmem:[%s5213_s2 + $0x30] sm:$0xf]  ;;  %v3550_v44 = vld [vmem:[%s5213_s2 + $0x30] sm:$0x10] }
 0x17a   :  { %v1835_v37 = vpop.f32.mrf.mxu3  ;;  %v1857_v29 = vsel %vm1853_vm2, 1.0, %v3576_v52  ;;  %v3287_v57 = vld [vmem:[%s5213_s2 + $0x38] sm:$0xf]  ;;  %v3283_v32 = vor.u32 %v3550_v44, %v3282_v46 }
 0x17b   :  { %v1780_v45 = vpop.f32.mrf.mxu0  ;;  %v1861_v1 = vpack.c.bf16 %v1857_v29, %v1857_v29  ;;  %v1836_v16 = vadd.f32 %v1835_v37, %v1817_v22 }
 0x17c   :  { %v1781_v59 = vadd.f32 %v1780_v45, %v1762_v50  ;;  %v1799_v61 = vpop.f32.mrf.mxu1  ;;  %v3551_v50 = vld [vmem:[%s5213_s2 + $0x38] sm:$0x10] }
 0x17d   :  { %v1906_v51 = vunpack.c.l.b16 %v1861_v1  ;;  %v1846_v4 = vmax.f32 %v1703_v31, %v1836_v16  ;;  %v3288_v22 = vor.u32 %v3551_v50, %v3287_v57  ;;  %v3548_v31 = vld [vmem:[%s5213_s2 + $0x20] sm:$0x10]  ;;  %v3277_v1 = vld [vmem:[%s5213_s2 + $0x28] sm:$0xf]  ;;  %v3549_v16 = vld [vmem:[%s5213_s2 + $0x28] sm:$0x10] }
 0x17e   :  { %v1800_v41 = vadd.f32 %v1799_v61, %v1781_v59  ;;  %v3273_v59 = vor.u32 %v3548_v31, %v3272_v58  ;;  %v3278_v60 = vor.u32 %v3549_v16, %v3277_v1  ;;  %v3302_v61 = vld [vmem:[%s5213_s2 + $0x50] sm:$0xf] }
 0x17f   :  { %v5067_v54 = vpack.c.b16 %v1906_v51, %v1905_v26  ;;  %v1850_v36 = vmax.f32 %v1842_v39, %v1846_v4 }
 0x180   :  { %v1818_v47 = vpop.f32.mrf.mxu2 }
 0x181   :  { %v1819_v17 = vadd.f32 %v1818_v47, %v1800_v41  ;;  %2113 = vrot.lane.b32.xlu0 %v5067_v54, %s3577_s0  ;;  %1911 = vrot.lane.b32.xlu2 %v5067_v54, %s3578_s14  ;;  %vm1854_vm3 = vcmp.ge.f32.partialorder %v1850_v36, 0.0  ;;  %v3307_v36 = vld [vmem:[%s5213_s2 + $0x58] sm:$0xf]  ;;  %v3555_v41 = vld [vmem:[%s5213_s2 + $0x58] sm:$0x10] }
 0x182   :  { %v1837_v56 = vpop.f32.mrf.mxu3  ;;  %1963 = vrot.lane.b32.xlu1 %v5067_v54, %s3579_s15  ;;  %v1858_v39 = vsel %vm1854_vm3, 1.0, %v3576_v52  ;;  %v3308_v48 = vor.u32 %v3555_v41, %v3307_v36 }
 0x183   :  { %v1838_v43 = vadd.f32 %v1837_v56, %v1819_v17  ;;  %v1862_v63 = vpack.c.bf16 %v1858_v39, %v1858_v39 }
 0x185   :  { %v1847_v38 = vmax.f32 %v1705_v27, %v1838_v43  ;;  %v1907_v3 = vunpack.c.l.b16 %v1862_v63  ;;  %v3292_v27 = vld [vmem:[%s5213_s2 + $0x40] sm:$0xf]  ;;  %v3552_v43 = vld [vmem:[%s5213_s2 + $0x40] sm:$0x10]  ;;  %v3553_v63 = vld [vmem:[%s5213_s2 + $0x48] sm:$0x10] }
 0x186   :  { %v3293_v39 = vor.u32 %v3552_v43, %v3292_v27 }
 0x187   :  { %v1851_v23 = vmax.f32 %v1843_v15, %v1847_v38  ;;  %v3257_v15 = vld [vmem:[%s5213_s2] sm:$0xf] }
 0x188   :  { %v3258_v6 = vor.u32 %v3544_v53, %v3257_v15  ;;  %v3327_v53 = vld [vmem:[%s5213_s2 + $0x78] sm:$0xf] }
 0x189   :  { %vm1855_vm4 = vcmp.ge.f32.partialorder %v1851_v23, 0.0  ;;  %1993 = vrot.lane.b32.xlu2 %v5067_v54, %s3580_s16  ;;  %v3297_v23 = vld [vmem:[%s5213_s2 + $0x48] sm:$0xf] }
 0x18a   :  { %v1859_v0 = vsel %vm1855_vm4, 1.0, %v3576_v52  ;;  %2083 = vrot.lane.b32.xlu1 %v5067_v54, %s3581_s17 }
 0x18b   :  { %v1863_v2 = vpack.c.bf16 %v1859_v0, %v1859_v0 }
 0x18d   :  { %v1908_v35 = vunpack.c.l.b16 %v1863_v2  ;;  %v3298_v2 = vor.u32 %v3553_v63, %v3297_v23 }
 0x18f   :  { %v1910_v5 = vpack.c.b16 %v1908_v35, %v1907_v3  ;;  %v3322_v35 = vld [vmem:[%s5213_s2 + $0x70] sm:$0xf] }
 0x191   :  { %2023 = vrot.lane.b32.xlu2 %v5067_v54, %s3582_s18  ;;  %1965 = vrot.lane.b32.xlu0 %v1910_v5, %s3579_s15 }
 0x192   :  { %1995 = vrot.lane.b32.xlu1 %v1910_v5, %s3580_s16  ;;  %1950 = vmatpush.bf16.msrb.mxu1 %v1910_v5 }
 0x196   :  { %1951 = vmatpush.bf16.msrb.mxu1 %v5067_v54 }
 0x199   :  { %2115 = vrot.lane.b32.xlu2 %v1910_v5, %s3577_s0  ;;  %1913 = vrot.lane.b32.xlu0 %v1910_v5, %s3578_s14 }
 0x19a   :  { %2053 = vrot.lane.b32.xlu1 %v5067_v54, %s3583_s19  ;;  %3259 = vmatmul.msk.bf16.vlgmr.msrb.gmra.mxu1 %vm1301_vm0, %v3258_v6  ;;  %v3559_v6 = vld [vmem:[%s5213_s2 + $0x78] sm:$0x10] }
 0x1a1   :  { %2233 = vrot.lane.b32.xlu2 %v5067_v54, %s3584_s1  ;;  %2085 = vrot.lane.b32.xlu0 %v1910_v5, %s3581_s17 }
 0x1a2   :  { %2025 = vrot.lane.b32.xlu1 %v1910_v5, %s3582_s18 }
 0x1a9   :  { %2205 = vrot.lane.b32.xlu2 %v1910_v5, %s3585_s20  ;;  %2055 = vrot.lane.b32.xlu0 %v1910_v5, %s3583_s19 }
 0x1aa   :  { %2143 = vrot.lane.b32.xlu1 %v5067_v54, %s3586_s21 }
 0x1b1   :  { %2175 = vrot.lane.b32.xlu2 %v1910_v5, %s3587_s22  ;;  %2203 = vrot.lane.b32.xlu0 %v5067_v54, %s3585_s20 }
 0x1b2   :  { %2235 = vrot.lane.b32.xlu1 %v1910_v5, %s3584_s1 }
 0x1b9   :  { %2323 = vrot.lane.b32.xlu2 %v5067_v54, %s3588_s23  ;;  %2145 = vrot.lane.b32.xlu0 %v1910_v5, %s3586_s21 }
 0x1ba   :  { %2325 = vrot.lane.b32.xlu1 %v1910_v5, %s3588_s23 }
 0x1c1   :  { %2265 = vrot.lane.b32.xlu2 %v1910_v5, %s3589_s24  ;;  %2173 = vrot.lane.b32.xlu0 %v5067_v54, %s3587_s22 }
 0x1c2   :  { %2295 = vrot.lane.b32.xlu1 %v1910_v5, %s3590_s25 }
 0x1c9   :  { %2293 = vrot.lane.b32.xlu2 %v5067_v54, %s3590_s25  ;;  %2355 = vrot.lane.b32.xlu0 %v1910_v5, %s3591_s26  ;;  %v3558_v5 = vld [vmem:[%s5213_s2 + $0x70] sm:$0x10] }
 0x1ca   :  { %2353 = vrot.lane.b32.xlu1 %v5067_v54, %s3591_s26 }
 0x1d1   :  { %2263 = vrot.lane.b32.xlu0 %v5067_v54, %s3589_s24  ;;  %v3554_v54 = vld [vmem:[%s5213_s2 + $0x50] sm:$0x10] }
 0x1d2   :  { %v3303_v47 = vor.u32 %v3554_v54, %v3302_v61 }
 0x1db   :  { %v1912_v42 = vpop.permute.xlu2 %1911 }
 0x1e3   :  { %v1994_v62 = vpop.permute.xlu2 %1993 }
 0x1eb   :  { %v2024_v7 = vpop.permute.xlu2 %2023 }
 0x1f3   :  { %v2114_v9 = vpop.permute.xlu0 %2113  ;;  %v2116_v10 = vpop.permute.xlu2 %2115 }
 0x1f4   :  { %v1964_v8 = vpop.permute.xlu1 %1963 }
 0x1fb   :  { %v2234_v20 = vpop.permute.xlu2 %2233 }
 0x1fc   :  { %v2084_v11 = vpop.permute.xlu1 %2083 }
 0x203   :  { %v1966_v12 = vpop.permute.xlu0 %1965  ;;  %v2206_v28 = vpop.permute.xlu2 %2205 }
 0x204   :  { %v1996_v13 = vpop.permute.xlu1 %1995  ;;  %1978 = vmatpush.bf16.msrb.mxu2 %v1966_v12  ;;  %v3557_v12 = vld [vmem:[%s5213_s2 + $0x68] sm:$0x10] }
 0x205   :  { %2008 = vmatpush.bf16.msrb.mxu3 %v1996_v13 }
 0x208   :  { %1979 = vmatpush.bf16.msrb.mxu2 %v1964_v8  ;;  %v3312_v8 = vld [vmem:[%s5213_s2 + $0x60] sm:$0xf] }
 0x209   :  { %2009 = vmatpush.bf16.msrb.mxu3 %v1994_v62 }
 0x20b   :  { %v1914_v40 = vpop.permute.xlu0 %1913  ;;  %3264 = vmatmul.msk.bf16.vlgmr.msrb.gmra.mxu2 %vm1301_vm0, %v3263_v21  ;;  %v2176_v37 = vpop.permute.xlu2 %2175 }
 0x20c   :  { %v2054_v33 = vpop.permute.xlu1 %2053  ;;  %1926 = vmatpush.bf16.msrb.mxu0 %v1914_v40  ;;  %3269 = vmatmul.msk.bf16.vlgmr.msrb.gmra.mxu3 %vm1301_vm0, %v3268_v24 }
 0x20d   :  { %2128 = vmatpush.bf16.msra.mxu3 %v2116_v10  ;;  %v3556_v10 = vld [vmem:[%s5213_s2 + $0x60] sm:$0x10] }
 0x20e   :  { %v3313_v34 = vor.u32 %v3556_v10, %v3312_v8 }
 0x210   :  { %1927 = vmatpush.bf16.msrb.mxu0 %v1912_v42  ;;  %v3323_v42 = vor.u32 %v3558_v5, %v3322_v35 }
 0x211   :  { %2129 = vmatpush.bf16.msra.mxu3 %v2114_v9  ;;  %v3328_v9 = vor.u32 %v3559_v6, %v3327_v53 }
 0x213   :  { %3254 = vmatmul.msk.bf16.vlgmr.msrb.gmra.mxu0 %vm1301_vm0, %v3253_v49  ;;  %v2086_v52 = vpop.permute.xlu0 %2085  ;;  %v2324_v51 = vpop.permute.xlu2 %2323 }
 0x214   :  { %v2026_v30 = vpop.permute.xlu1 %2025  ;;  %2098 = vmatpush.bf16.msra.mxu2 %v2086_v52 }
 0x215   :  { %2038 = vmatpush.bf16.msra.mxu0 %v2026_v30 }
 0x217   :  { %v1953_v21 = vpop.f32.mrf.mxu1 }
 0x218   :  { %2099 = vmatpush.bf16.msra.mxu2 %v2084_v11  ;;  %v3317_v11 = vld [vmem:[%s5213_s2 + $0x68] sm:$0xf] }
 0x219   :  { %2039 = vmatpush.bf16.msra.mxu0 %v2024_v7  ;;  %v3318_v55 = vor.u32 %v3557_v12, %v3317_v11 }
 0x21b   :  { %v2056_v45 = vpop.permute.xlu0 %2055  ;;  %3284 = vmatmul.msk.bf16.vlgmr.msra.gmra.mxu2 %vm1301_vm0, %v3283_v32  ;;  %v2266_v38 = vpop.permute.xlu2 %2265 }
 0x21c   :  { %2218 = vmatpush.bf16.msrb.mxu2 %v2206_v28  ;;  %v2144_v29 = vpop.permute.xlu1 %2143  ;;  %2068 = vmatpush.bf16.msra.mxu1 %v2056_v45 }
 0x21d   :  { %3289 = vmatmul.msk.bf16.vlgmr.msra.gmra.mxu3 %vm1301_vm0, %v3288_v22 }
 0x21f   :  { %v1955_v18 = vpop.f32.mrf.mxu1 }
 0x220   :  { %2069 = vmatpush.bf16.msra.mxu1 %v2054_v33 }
 0x223   :  { %3274 = vmatmul.msk.bf16.vlgmr.msra.gmra.mxu0 %vm1301_vm0, %v3273_v59  ;;  %v2204_v26 = vpop.permute.xlu0 %2203  ;;  %3279 = vmatmul.msk.bf16.vlgmr.msra.gmra.mxu1 %vm1301_vm0, %v3278_v60  ;;  %v2294_v62 = vpop.permute.xlu2 %2293 }
 0x224   :  { %2188 = vmatpush.bf16.msrb.mxu1 %v2176_v37  ;;  %v2236_v4 = vpop.permute.xlu1 %2235  ;;  %2219 = vmatpush.bf16.msrb.mxu2 %v2204_v26 }
 0x225   :  { %2248 = vmatpush.bf16.msrb.mxu3 %v2236_v4 }
 0x229   :  { %2249 = vmatpush.bf16.msrb.mxu3 %v2234_v20 }
 0x22b   :  { %v2146_v17 = vpop.permute.xlu0 %2145  ;;  %3304 = vmatmul.msk.bf16.vlgmr.msrb.gmra.mxu2 %vm1301_vm0, %v3303_v47 }
 0x22c   :  { %v2326_v56 = vpop.permute.xlu1 %2325  ;;  %2158 = vmatpush.bf16.msrb.mxu0 %v2146_v17 }
 0x22d   :  { %3309 = vmatmul.msk.bf16.vlgmr.msrb.gmra.mxu3 %vm1301_vm0, %v3308_v48  ;;  %2338 = vmatpush.bf16.msra.mxu2 %v2326_v56 }
 0x230   :  { %2159 = vmatpush.bf16.msrb.mxu0 %v2144_v29 }
 0x231   :  { %2339 = vmatpush.bf16.msra.mxu2 %v2324_v51 }
 0x233   :  { %3294 = vmatmul.msk.bf16.vlgmr.msrb.gmra.mxu0 %vm1301_vm0, %v3293_v39  ;;  %v2174_v0 = vpop.permute.xlu0 %2173 }
 0x234   :  { %2278 = vmatpush.bf16.msra.mxu0 %v2266_v38  ;;  %v2296_v3 = vpop.permute.xlu1 %2295  ;;  %2189 = vmatpush.bf16.msrb.mxu1 %v2174_v0 }
 0x237   :  { %3299 = vmatmul.msk.bf16.vlgmr.msrb.gmra.mxu1 %vm1301_vm0, %v3298_v2 }
 0x238   :  { %2308 = vmatpush.bf16.msra.mxu1 %v2296_v3 }
 0x23b   :  { %v2356_v15 = vpop.permute.xlu0 %2355  ;;  %3324 = vmatmul.msk.bf16.vlgmr.msra.gmra.mxu2 %vm1301_vm0, %v3323_v42 }
 0x23c   :  { %2309 = vmatpush.bf16.msra.mxu1 %v2294_v62  ;;  %2368 = vmatpush.bf16.msra.mxu3 %v2356_v15  ;;  %v2354_v7 = vpop.permute.xlu1 %2353 }
 0x240   :  { %2369 = vmatpush.bf16.msra.mxu3 %v2354_v7 }
 0x243   :  { %v2264_v13 = vpop.permute.xlu0 %2263  ;;  %3329 = vmatmul.msk.bf16.vlgmr.msra.gmra.mxu3 %vm1301_vm0, %v3328_v9 }
 0x244   :  { %2279 = vmatpush.bf16.msra.mxu0 %v2264_v13 }
 0x247   :  { %3314 = vmatmul.msk.bf16.vlgmr.msra.gmra.mxu0 %vm1301_vm0, %v3313_v34  ;;  %3319 = vmatmul.msk.bf16.vlgmr.msra.gmra.mxu1 %vm1301_vm0, %v3318_v55 }
 0x28e   :  { %v1981_v14 = vpop.f32.mrf.mxu2 }
 0x28f   :  { %v2011_v19 = vpop.f32.mrf.mxu3 }
 0x290   :  { %v1929_v20 = vpop.f32.mrf.mxu0 }
 0x291   :  { %v1954_v28 = vadd.f32 %v1953_v21, %v1929_v20 }
 0x293   :  { %v1986_v46 = vadd.f32 %v1981_v14, %v1954_v28 }
 0x295   :  { %v2016_v50 = vadd.f32 %v2011_v19, %v1986_v46 }
 0x296   :  { %v1983_v24 = vpop.f32.mrf.mxu2 }
 0x297   :  { %v2013_v33 = vpop.f32.mrf.mxu3 }
 0x298   :  { %v1931_v40 = vpop.f32.mrf.mxu0 }
 0x299   :  { %v1956_v32 = vadd.f32 %v1955_v18, %v1931_v40 }
 0x29b   :  { %v1987_v58 = vadd.f32 %v1983_v24, %v1956_v32 }
 0x29d   :  { %v2017_v31 = vadd.f32 %v2013_v33, %v1987_v58 }
 0x29e   :  { %v2101_v25 = vpop.f32.mrf.mxu2 }
 0x2a0   :  { %v2041_v49 = vpop.f32.mrf.mxu0  ;;  %v2071_v52 = vpop.f32.mrf.mxu1 }
 0x2a1   :  { %v2131_v30 = vpop.f32.mrf.mxu3  ;;  %v2046_v22 = vadd.f32 %v2041_v49, %v2016_v50 }
 0x2a3   :  { %v2076_v29 = vadd.f32 %v2071_v52, %v2046_v22 }
 0x2a5   :  { %v2106_v59 = vadd.f32 %v2101_v25, %v2076_v29 }
 0x2a6   :  { %v2103_v44 = vpop.f32.mrf.mxu2 }
 0x2a7   :  { %v2136_v4 = vadd.f32 %v2131_v30, %v2106_v59 }
 0x2a8   :  { %v2043_v57 = vpop.f32.mrf.mxu0  ;;  %v2073_v37 = vpop.f32.mrf.mxu1 }
 0x2a9   :  { %v2133_v45 = vpop.f32.mrf.mxu3  ;;  %v2047_v60 = vadd.f32 %v2043_v57, %v2017_v31 }
 0x2ab   :  { %v2077_v61 = vadd.f32 %v2073_v37, %v2047_v60 }
 0x2ad   :  { %v2107_v36 = vadd.f32 %v2103_v44, %v2077_v61 }
 0x2ae   :  { %v2221_v1 = vpop.f32.mrf.mxu2 }
 0x2af   :  { %v2137_v56 = vadd.f32 %v2133_v45, %v2107_v36 }
 0x2b0   :  { %v2161_v16 = vpop.f32.mrf.mxu0 }
 0x2b1   :  { %v2251_v51 = vpop.f32.mrf.mxu3  ;;  %v2166_v54 = vadd.f32 %v2161_v16, %v2136_v4 }
 0x2b4   :  { %v2191_v26 = vpop.f32.mrf.mxu1 }
 0x2b5   :  { %v2196_v41 = vadd.f32 %v2191_v26, %v2166_v54 }
 0x2b6   :  { %v2223_v47 = vpop.f32.mrf.mxu2 }
 0x2b7   :  { %v2226_v27 = vadd.f32 %v2221_v1, %v2196_v41 }
 0x2b8   :  { %v2163_v48 = vpop.f32.mrf.mxu0 }
 0x2b9   :  { %v2253_v43 = vpop.f32.mrf.mxu3  ;;  %v2167_v38 = vadd.f32 %v2163_v48, %v2137_v56  ;;  %v2256_v39 = vadd.f32 %v2251_v51, %v2226_v27 }
 0x2bc   :  { %v2193_v17 = vpop.f32.mrf.mxu1 }
 0x2bd   :  { %v2197_v23 = vadd.f32 %v2193_v17, %v2167_v38 }
 0x2be   :  { %v2341_v3 = vpop.f32.mrf.mxu2 }
 0x2bf   :  { %v2227_v35 = vadd.f32 %v2223_v47, %v2197_v23 }
 0x2c1   :  { %v2257_v15 = vadd.f32 %v2253_v43, %v2227_v35 }
 0x2c4   :  { %v2281_v63 = vpop.f32.mrf.mxu0  ;;  %v2311_v0 = vpop.f32.mrf.mxu1 }
 0x2c5   :  { %v2286_v2 = vadd.f32 %v2281_v63, %v2256_v39 }
 0x2c6   :  { %v2371_v42 = vpop.f32.mrf.mxu3  ;;  %v2343_v10 = vpop.f32.mrf.mxu2 }
 0x2c7   :  { %v2316_v5 = vadd.f32 %v2311_v0, %v2286_v2 }
 0x2c9   :  { %v2346_v62 = vadd.f32 %v2341_v3, %v2316_v5 }
 0x2cb   :  { %v2376_v53 = vadd.f32 %v2371_v42, %v2346_v62 }
 0x2cc   :  { %v2283_v6 = vpop.f32.mrf.mxu0  ;;  %v2313_v8 = vpop.f32.mrf.mxu1 }
 0x2cd   :  { %2379 = vst.msk [vmem:[%s5214_s3] sm:$0xff] %vm2378_vm5, %v2376_v53  ;;  %v2287_v7 = vadd.f32 %v2283_v6, %v2257_v15 }
 0x2ce   :  { %v2373_v12 = vpop.f32.mrf.mxu3 }
 0x2cf   :  { %v2317_v9 = vadd.f32 %v2313_v8, %v2287_v7 }
 0x2d1   :  { %v2347_v11 = vadd.f32 %v2343_v10, %v2317_v9 }
 0x2d3   :  { %v2377_v13 = vadd.f32 %v2373_v12, %v2347_v11 }
 0x2d5   :  { %2381 = vst.msk [vmem:[%s5214_s3 + $0x8] sm:$0x3] %vm2380_vm6, %v2377_v13 }

</bundles_post_ra>
